<compile_context>
chip_gen: v6e
topology: v6e:2x2x1
jax: 0.10.0
libtpu: 0.0.40
codegen_flags: <defaults>
</compile_context>

<pallas_src>
import functools

import numpy as np
import jax
import jax.numpy as jnp
from jax.experimental import pallas as pl
from jax.experimental.pallas import tpu as pltpu


# --------------------------- anchor utilities (numpy glue) ---------------------------

def generate_anchor_base(base_size=16, ratios=(0.5, 1, 2), anchor_scales=(8, 16, 32)):
    py = base_size / 2.0
    px = base_size / 2.0
    anchor_base = np.zeros((len(ratios) * len(anchor_scales), 4), dtype=np.float32)
    for i in range(len(ratios)):
        for j in range(len(anchor_scales)):
            h = base_size * anchor_scales[j] * np.sqrt(ratios[i])
            w = base_size * anchor_scales[j] * np.sqrt(1.0 / ratios[i])
            index = i * len(anchor_scales) + j
            anchor_base[index, 0] = py - h / 2.0
            anchor_base[index, 1] = px - w / 2.0
            anchor_base[index, 2] = py + h / 2.0
            anchor_base[index, 3] = px + w / 2.0
    return anchor_base


def _enumerate_shifted_anchor(anchor_base, feat_stride, height, width):
    shift_y = np.arange(0, height * feat_stride, feat_stride)
    shift_x = np.arange(0, width * feat_stride, feat_stride)
    shift_x, shift_y = np.meshgrid(shift_x, shift_y)
    shift = np.stack((shift_y.ravel(), shift_x.ravel(),
                      shift_y.ravel(), shift_x.ravel()), axis=1)
    A = anchor_base.shape[0]
    K = shift.shape[0]
    anchor = anchor_base.reshape((1, A, 4)) + \
        shift.reshape((1, K, 4)).transpose((1, 0, 2))
    anchor = anchor.reshape((K * A, 4)).astype(np.float32)
    return anchor


# -------------------------------- Pallas kernel --------------------------------------

def _rpn_kernel(x_ref, w1_ref, b1_ref, wh_ref, bh_ref, mask_ref, out_ref, *,
                tile_h, width):
    """One (batch, row-tile) step.

    x_ref   : (H_pad+2, W_al+2, Cin)  padded NHWC map of this batch element (resident)
    w1_ref  : (3, 3*Cin, Cmid_al)     3x3 conv weights, dx folded into contraction dim
    b1_ref  : (1, Cmid_al)            f32
    wh_ref  : (Cmid_al, 128)          fused heads [loc | scores | (w_fg - w_bg) | 0]
    bh_ref  : (1, 128)                f32, merged biases
    mask_ref: (1, 128)                1.0 on the fg-logit lanes (sigmoid gate)
    out_ref : (tile_h*W_al, 128)      packed, lane-dense output tile
    """
    th, w = tile_h, width
    cin = x_ref.shape[2]
    rows = th * w
    row0 = pl.multiple_of(pl.program_id(1) * th, th)   # first padded row of the window

    # ---- 3x3 conv (pad=1): hoist the dx shifts once per step (2 misaligned slices
    #      instead of 6), fold dx into the contraction dim -> 3 matmuls accumulated
    #      in a local f32 value (no scratch read-modify-write).
    win = x_ref[pl.ds(row0, th + 2), :, :]                                # (th+2, W_al+2, cin)
    xcat = jnp.concatenate(
        [win[:, 0:w, :], win[:, 1:1 + w, :], win[:, 2:2 + w, :]], axis=-1)  # (th+2, w, 3*cin)

    acc = None
    for dy in range(3):
        xs = xcat[dy:dy + th].reshape(rows, 3 * cin)    # major-dim slice + free reshape
        p = jnp.dot(xs, w1_ref[dy], preferred_element_type=jnp.float32)
        acc = p if acc is None else acc + p
    h = jnp.maximum(acc + b1_ref[...], 0.0)             # (rows, Cmid_al) f32

    # ---- fused 1x1 heads: single wide MXU matmul, one lane-dense unmasked store.
    heads = jnp.dot(h.astype(wh_ref.dtype), wh_ref[...],
                    preferred_element_type=jnp.float32) + bh_ref[...]
    # fg probability lanes only: sigmoid(s_fg - s_bg) == softmax([bg, fg])[1]
    out = jnp.where(mask_ref[...] > 0.0, jax.nn.sigmoid(heads), heads)
    out_ref[...] = out.astype(out_ref.dtype)


# --------------------------------- wrapper / glue -------------------------------------

def _round_up(x, m):
    return (x + m - 1) // m * m


def _pick_tile_h(H, w_al, block_rows, n_batch):
    """cdiv-based row tiling: tile rows = th*w_al stay <= block_rows (and >= 1 row)."""
    th = max(1, min(H, block_rows // max(w_al, 1)))
    if n_batch == 1 and H >= 2:
        # v7x megacore: with a single batch element all grid parallelism comes from
        # the row-tile axis -> keep at least 2 tiles so both TensorCores get work.
        th = min(th, -(-H // 2))
    r = -(-H // th)
    return th, r


def init_params(key, in_channels, mid_channels, n_anchor, std=0.01):
    """Deterministic stand-in for normal_init(m, 0, 0.01) (weights ~ N(0, std), bias = 0)."""
    k1, k2, k3 = jax.random.split(key, 3)
    return dict(
        w_conv1=std * jax.random.normal(k1, (mid_channels, in_channels, 3, 3), jnp.float32),
        b_conv1=jnp.zeros((mid_channels,), jnp.float32),
        w_score=std * jax.random.normal(k2, (n_anchor * 2, mid_channels, 1, 1), jnp.float32),
        b_score=jnp.zeros((n_anchor * 2,), jnp.float32),
        w_loc=std * jax.random.normal(k3, (n_anchor * 4, mid_channels, 1, 1), jnp.float32),
        b_loc=jnp.zeros((n_anchor * 4,), jnp.float32),
    )


def rpn_forward(x_nchw, params, feat_stride=16, img_size=(256, 256), scale=1.0,
                ratios=(0.5, 1, 2), anchor_scales=(8, 16, 32),
                block_rows=1024, matmul_dtype=jnp.bfloat16,
                vmem_limit_bytes=64 * 1024 * 1024):
    n, Cin, H, W = x_nchw.shape
    Cmid = params["w_conv1"].shape[0]
    A = params["w_score"].shape[0] // 2
    NOUT = 128                                      # lane-dense packed output width
    assert 7 * A <= NOUT, "packed head layout must fit in 128 lanes"

    # ---- anchors (pure numpy, identical to the PyTorch reference) ----
    anchor_base = generate_anchor_base(16, ratios, anchor_scales)
    anchor = _enumerate_shifted_anchor(anchor_base, feat_stride, H, W)

    # ---- tiling: pad W to a sublane multiple so in-kernel reshapes/slices are free
    #      views, cdiv-tile H (padding H) so tile rows stay large for any input size.
    sub = 8 * (4 // jnp.dtype(matmul_dtype).itemsize)     # 8 for f32, 16 for bf16
    W_al = _round_up(W, sub)
    TH, R = _pick_tile_h(H, W_al, block_rows, n)
    H_pad = TH * R
    rows = TH * W_al                                      # always a multiple of `sub`
    HWp = H_pad * W_al

    Cmid_al = _round_up(Cmid, 128)                        # MXU lane occupancy (zero pad)

    # ---- parameter packing ----
    # conv1 (Cmid, Cin, 3, 3) -> (ky, kx*Cin + i, Cmid_al): dx folded into contraction.
    w1 = jnp.transpose(params["w_conv1"], (2, 3, 1, 0)).reshape(3, 3 * Cin, Cmid)
    w1 = jnp.pad(w1, ((0, 0), (0, 0), (0, Cmid_al - Cmid))).astype(matmul_dtype)
    b1 = jnp.pad(params["b_conv1"], (0, Cmid_al - Cmid)).reshape(1, Cmid_al)
    b1 = b1.astype(jnp.float32)

    # fused heads: [loc (4A) | scores interleaved bg/fg (2A) | w_fg - w_bg (A) | zero pad]
    w_loc = params["w_loc"][:, :, 0, 0].T                 # (Cmid, 4A), PyTorch channel order
    w_sc = params["w_score"][:, :, 0, 0].T                # (Cmid, 2A), interleaved bg/fg
    w_diff = w_sc[:, 1::2] - w_sc[:, 0::2]                # (Cmid, A): fg - bg logit weights
    w_heads = jnp.concatenate([w_loc, w_sc, w_diff], axis=1)
    w_heads = jnp.pad(w_heads, ((0, Cmid_al - Cmid), (0, NOUT - 7 * A)))
    w_heads = w_heads.astype(matmul_dtype)

    b_diff = params["b_score"][1::2] - params["b_score"][0::2]
    b_heads = jnp.concatenate([params["b_loc"], params["b_score"], b_diff])
    b_heads = jnp.pad(b_heads, (0, NOUT - 7 * A)).reshape(1, NOUT).astype(jnp.float32)

    # precomputed sigmoid gate for the fg-logit lanes [6A, 7A)
    sig_mask = jnp.zeros((1, NOUT), jnp.float32).at[0, 6 * A:7 * A].set(1.0)

    # ---- NCHW -> padded NHWC: +1 halo top/left, +1 + alignment pad bottom/right ----
    x_nhwc = jnp.transpose(x_nchw, (0, 2, 3, 1))
    x_pad = jnp.pad(x_nhwc, ((0, 0), (1, 1 + H_pad - H), (1, 1 + W_al - W), (0, 0)))
    x_pad = x_pad.astype(matmul_dtype)
    Hp, Wp = H_pad + 2, W_al + 2

    kernel = functools.partial(_rpn_kernel, tile_h=TH, width=W_al)

    # TODO(synk): on v7x (64 MiB VMEM) a large backbone map should be halo-tiled via
    # manual double-buffered DMA (memory_space=pl.ANY) instead of kept fully resident.
    def call_kernel(single_buffer_params):
        pm = dict(pipeline_mode=pl.Buffered(1)) if single_buffer_params else {}
        const = lambda shape: pl.BlockSpec(
            shape, lambda b, r, _nd=len(shape): (0,) * _nd, **pm)
        out = pl.pallas_call(
            kernel,
            out_shape=jax.ShapeDtypeStruct((n, HWp, NOUT), jnp.float32),
            grid=(n, R),
            in_specs=[
                # padded feature map: one block per batch element, resident across row tiles
                pl.BlockSpec((None, Hp, Wp, Cin), lambda b, r: (b, 0, 0, 0)),
                const((3, 3 * Cin, Cmid_al)),   # conv1 weights (dx folded)
                const((1, Cmid_al)),            # conv1 bias
                const((Cmid_al, NOUT)),         # fused head weights (lane padded)
                const((1, NOUT)),               # fused head biases
                const((1, NOUT)),               # sigmoid lane mask
            ],
            out_specs=pl.BlockSpec((None, rows, NOUT), lambda b, r: (b, r, 0)),
            compiler_params=pltpu.CompilerParams(
                dimension_semantics=("parallel", "parallel"),
                vmem_limit_bytes=vmem_limit_bytes),
        )(x_pad, w1, b1, w_heads, b_heads, sig_mask)
        return jax.block_until_ready(out)

    try:
        packed = call_kernel(True)      # single-buffer the grid-invariant param blocks
    except Exception:                   # fallback if BlockSpec pipeline_mode unsupported
        packed = call_kernel(False)

    # ---- cheap wrapper-side unpacking: drop alignment padding, split packed lanes ----
    packed = packed.reshape(n, H_pad, W_al, NOUT)[:, :H, :W, :]
    rpn_locs = packed[..., :4 * A].reshape(n, H * W * A, 4)            # (n, H*W*A, 4)
    rpn_scores = packed[..., 4 * A:6 * A].reshape(n, H * W * A, 2)     # (n, H*W*A, 2)
    rpn_fg_scores = packed[..., 6 * A:7 * A].reshape(n, H * W * A)     # (n, H*W*A)

    # TODO(synk): ProposalCreator (bbox decode + clip + top-k sort + NMS) has no clean
    # Pallas equivalent; rois / roi_indices are not produced by this kernel.
    return rpn_locs, rpn_scores, rpn_fg_scores, anchor


# ------------------------------ pure-JAX reference ------------------------------------

def rpn_reference(x_nchw, params):
    dn = ("NCHW", "OIHW", "NCHW")
    h = jax.lax.conv_general_dilated(x_nchw, params["w_conv1"], (1, 1),
                                     ((1, 1), (1, 1)), dimension_numbers=dn)
    h = jnp.maximum(h + params["b_conv1"][None, :, None, None], 0.0)
    locs = jax.lax.conv_general_dilated(h, params["w_loc"], (1, 1),
                                        ((0, 0), (0, 0)), dimension_numbers=dn)
    locs = locs + params["b_loc"][None, :, None, None]
    scores = jax.lax.conv_general_dilated(h, params["w_score"], (1, 1),
                                          ((0, 0), (0, 0)), dimension_numbers=dn)
    scores = scores + params["b_score"][None, :, None, None]
    n = x_nchw.shape[0]
    rpn_locs = jnp.transpose(locs, (0, 2, 3, 1)).reshape(n, -1, 4)
    rpn_scores = jnp.transpose(scores, (0, 2, 3, 1)).reshape(n, -1, 2)
    rpn_fg = jax.nn.softmax(rpn_scores, axis=-1)[..., 1].reshape(n, -1)
    return rpn_locs, rpn_scores, rpn_fg


# ------------------------------------- main --------------------------------------------

if __name__ == "__main__":
    # Small shapes consistent with the module's forward: NCHW feature map.
    N, CIN, H, W = 2, 4, 16, 16
    CMID = 32
    N_ANCHOR = 9  # len(ratios) * len(anchor_scales) = 3 * 3
    FEAT_STRIDE = 16
    IMG_SIZE = (H * FEAT_STRIDE, W * FEAT_STRIDE)

    key = jax.random.PRNGKey(0)
    kx, kp = jax.random.split(key)
    x = jax.random.normal(kx, (N, CIN, H, W), jnp.float32)
    params = init_params(kp, CIN, CMID, N_ANCHOR)

    # block_rows=128 -> TH=8, grid=(2, 2): exercises the row-tile axis at toy shapes.
    rpn_locs, rpn_scores, rpn_fg_scores, anchor = rpn_forward(
        x, params, feat_stride=FEAT_STRIDE, img_size=IMG_SIZE, scale=1.0,
        block_rows=128)
    jax.block_until_ready((rpn_locs, rpn_scores, rpn_fg_scores))

    # sanity check against a pure-JAX f32 reference (bf16 operands -> relaxed tolerance)
    ref_locs, ref_scores, ref_fg = rpn_reference(x, params)
    assert rpn_locs.shape == (N, H * W * N_ANCHOR, 4)
    assert rpn_scores.shape == (N, H * W * N_ANCHOR, 2)
    assert rpn_fg_scores.shape == (N, H * W * N_ANCHOR)
    assert anchor.shape == (H * W * N_ANCHOR, 4)
    np.testing.assert_allclose(np.asarray(rpn_locs), np.asarray(ref_locs), atol=1e-3, rtol=2e-2)
    np.testing.assert_allclose(np.asarray(rpn_scores), np.asarray(ref_scores), atol=1e-3, rtol=2e-2)
    np.testing.assert_allclose(np.asarray(rpn_fg_scores), np.asarray(ref_fg), atol=1e-3, rtol=2e-2)

    print("KERNEL_OK")
</pallas_src>

<mosaic_0001>
module attributes {stable_mosaic.version = 11 : i64} {
  func.func @_rpn_kernel(%arg0: i32, %arg1: i32, %arg2: memref<1x18x18x4xbf16, #tpu.memory_space<vmem>>, %arg3: memref<3x12x128xbf16, #tpu.memory_space<vmem>>, %arg4: memref<1x128xf32, #tpu.memory_space<vmem>>, %arg5: memref<128x128xbf16, #tpu.memory_space<vmem>>, %arg6: memref<1x128xf32, #tpu.memory_space<vmem>>, %arg7: memref<1x128xf32, #tpu.memory_space<vmem>>, %arg8: memref<1x128x128xf32, #tpu.memory_space<vmem>>) attributes {dimension_semantics = [#tpu.dimension_semantics<parallel>, #tpu.dimension_semantics<parallel>], iteration_bounds = array<i64: 2, 2>, scalar_prefetch = 0 : i64, scratch_operands = 0 : i64, tpu.core_type = #tpu.core_type<tc>, window_params = [{transform_indices = @transform_0, window_bounds = array<i64: 1, 18, 18, 4>}, {pipeline_mode = #tpu.pipeline_mode<synchronous>, transform_indices = @transform_1, window_bounds = array<i64: 3, 12, 128>}, {pipeline_mode = #tpu.pipeline_mode<synchronous>, transform_indices = @transform_2, window_bounds = array<i64: 1, 128>}, {pipeline_mode = #tpu.pipeline_mode<synchronous>, transform_indices = @transform_3, window_bounds = array<i64: 128, 128>}, {pipeline_mode = #tpu.pipeline_mode<synchronous>, transform_indices = @transform_4, window_bounds = array<i64: 1, 128>}, {pipeline_mode = #tpu.pipeline_mode<synchronous>, transform_indices = @transform_5, window_bounds = array<i64: 1, 128>}, {transform_indices = @transform_6, window_bounds = array<i64: 1, 128, 128>}]} {
    %c8_i32 = arith.constant 8 : i32
    %0 = arith.muli %arg1, %c8_i32 : i32
    %1 = tpu.assume_multiple %0, 8 : i32
    %c0 = arith.constant 0 : index
    %2 = arith.index_cast %1 : i32 to index
    %c0_0 = arith.constant 0 : index
    %c0_1 = arith.constant 0 : index
    %3 = vector.load %arg2[%c0, %2, %c0_0, %c0_1] : memref<1x18x18x4xbf16, #tpu.memory_space<vmem>>, vector<1x10x18x4xbf16>
    %4 = vector.shape_cast %3 : vector<1x10x18x4xbf16> to vector<10x18x4xbf16>
    %5 = vector.extract_strided_slice %4 {offsets = [0, 0, 0], sizes = [10, 16, 4], strides = [1, 1, 1]} : vector<10x18x4xbf16> to vector<10x16x4xbf16>
    %6 = vector.extract_strided_slice %4 {offsets = [0, 1, 0], sizes = [10, 16, 4], strides = [1, 1, 1]} : vector<10x18x4xbf16> to vector<10x16x4xbf16>
    %7 = vector.extract_strided_slice %4 {offsets = [0, 2, 0], sizes = [10, 16, 4], strides = [1, 1, 1]} : vector<10x18x4xbf16> to vector<10x16x4xbf16>
    %8 = tpu.concatenate %5, %6, %7 in 2 : vector<10x16x4xbf16>, vector<10x16x4xbf16>, vector<10x16x4xbf16> -> vector<10x16x12xbf16>
    %9 = vector.extract_strided_slice %8 {offsets = [0, 0, 0], sizes = [8, 16, 12], strides = [1, 1, 1]} : vector<10x16x12xbf16> to vector<8x16x12xbf16>
    %10 = vector.shape_cast %9 : vector<8x16x12xbf16> to vector<128x12xbf16>
    %c0_2 = arith.constant 0 : index
    %c0_3 = arith.constant 0 : index
    %c0_4 = arith.constant 0 : index
    %11 = vector.load %arg3[%c0_2, %c0_3, %c0_4] : memref<3x12x128xbf16, #tpu.memory_space<vmem>>, vector<1x12x128xbf16>
    %12 = vector.shape_cast %11 : vector<1x12x128xbf16> to vector<12x128xbf16>
    %cst = arith.constant dense<0.000000e+00> : vector<128x128xf32>
    %13 = tpu.matmul %10, %12, %cst {dimension_numbers = #tpu.dot_dimension_numbers<[1], [0], [0], [1], [0, 0, 1, 1], [], []>} : vector<128x12xbf16>, vector<12x128xbf16>, vector<128x128xf32> -> vector<128x128xf32>
    %14 = vector.extract_strided_slice %8 {offsets = [1, 0, 0], sizes = [8, 16, 12], strides = [1, 1, 1]} : vector<10x16x12xbf16> to vector<8x16x12xbf16>
    %15 = vector.shape_cast %14 : vector<8x16x12xbf16> to vector<128x12xbf16>
    %c1 = arith.constant 1 : index
    %c0_5 = arith.constant 0 : index
    %c0_6 = arith.constant 0 : index
    %16 = vector.load %arg3[%c1, %c0_5, %c0_6] : memref<3x12x128xbf16, #tpu.memory_space<vmem>>, vector<1x12x128xbf16>
    %17 = vector.shape_cast %16 : vector<1x12x128xbf16> to vector<12x128xbf16>
    %cst_7 = arith.constant dense<0.000000e+00> : vector<128x128xf32>
    %18 = tpu.matmul %15, %17, %cst_7 {dimension_numbers = #tpu.dot_dimension_numbers<[1], [0], [0], [1], [0, 0, 1, 1], [], []>} : vector<128x12xbf16>, vector<12x128xbf16>, vector<128x128xf32> -> vector<128x128xf32>
    %19 = arith.addf %13, %18 : vector<128x128xf32>
    %20 = vector.extract_strided_slice %8 {offsets = [2, 0, 0], sizes = [8, 16, 12], strides = [1, 1, 1]} : vector<10x16x12xbf16> to vector<8x16x12xbf16>
    %21 = vector.shape_cast %20 : vector<8x16x12xbf16> to vector<128x12xbf16>
    %c2 = arith.constant 2 : index
    %c0_8 = arith.constant 0 : index
    %c0_9 = arith.constant 0 : index
    %22 = vector.load %arg3[%c2, %c0_8, %c0_9] : memref<3x12x128xbf16, #tpu.memory_space<vmem>>, vector<1x12x128xbf16>
    %23 = vector.shape_cast %22 : vector<1x12x128xbf16> to vector<12x128xbf16>
    %cst_10 = arith.constant dense<0.000000e+00> : vector<128x128xf32>
    %24 = tpu.matmul %21, %23, %cst_10 {dimension_numbers = #tpu.dot_dimension_numbers<[1], [0], [0], [1], [0, 0, 1, 1], [], []>} : vector<128x12xbf16>, vector<12x128xbf16>, vector<128x128xf32> -> vector<128x128xf32>
    %25 = arith.addf %19, %24 : vector<128x128xf32>
    %c0_11 = arith.constant 0 : index
    %c0_12 = arith.constant 0 : index
    %26 = vector.load %arg4[%c0_11, %c0_12] : memref<1x128xf32, #tpu.memory_space<vmem>>, vector<1x128xf32>
    %27 = vector.broadcast %26 : vector<1x128xf32> to vector<128x128xf32>
    %28 = arith.addf %25, %27 : vector<128x128xf32>
    %cst_13 = arith.constant 0.000000e+00 : f32
    %29 = vector.broadcast %cst_13 : f32 to vector<128x128xf32>
    %30 = arith.maximumf %28, %29 : vector<128x128xf32>
    %31 = arith.truncf %30 : vector<128x128xf32> to vector<128x128xbf16>
    %c0_14 = arith.constant 0 : index
    %c0_15 = arith.constant 0 : index
    %32 = vector.load %arg5[%c0_14, %c0_15] : memref<128x128xbf16, #tpu.memory_space<vmem>>, vector<128x128xbf16>
    %cst_16 = arith.constant dense<0.000000e+00> : vector<128x128xf32>
    %33 = tpu.matmul %31, %32, %cst_16 {dimension_numbers = #tpu.dot_dimension_numbers<[1], [0], [0], [1], [0, 0, 1, 1], [], []>} : vector<128x128xbf16>, vector<128x128xbf16>, vector<128x128xf32> -> vector<128x128xf32>
    %c0_17 = arith.constant 0 : index
    %c0_18 = arith.constant 0 : index
    %34 = vector.load %arg6[%c0_17, %c0_18] : memref<1x128xf32, #tpu.memory_space<vmem>>, vector<1x128xf32>
    %35 = vector.broadcast %34 : vector<1x128xf32> to vector<128x128xf32>
    %36 = arith.addf %33, %35 : vector<128x128xf32>
    %c0_19 = arith.constant 0 : index
    %c0_20 = arith.constant 0 : index
    %37 = vector.load %arg7[%c0_19, %c0_20] : memref<1x128xf32, #tpu.memory_space<vmem>>, vector<1x128xf32>
    %cst_21 = arith.constant 0.000000e+00 : f32
    %38 = vector.broadcast %cst_21 : f32 to vector<1x128xf32>
    %39 = arith.cmpf ogt, %37, %38 : vector<1x128xf32>
    %40 = arith.negf %36 : vector<128x128xf32>
    %41 = math.exp %40 : vector<128x128xf32>
    %cst_22 = arith.constant 1.000000e+00 : f32
    %42 = vector.broadcast %cst_22 : f32 to vector<128x128xf32>
    %43 = arith.addf %42, %41 : vector<128x128xf32>
    %44 = arith.divf %42, %43 : vector<128x128xf32>
    %45 = vector.shape_cast %39 : vector<1x128xi1> to vector<1x128xi1>
    %46 = vector.broadcast %45 : vector<1x128xi1> to vector<128x128xi1>
    %47 = arith.select %46, %44, %36 : vector<128x128xi1>, vector<128x128xf32>
    %c0_23 = arith.constant 0 : index
    %c0_24 = arith.constant 0 : index
    %c0_25 = arith.constant 0 : index
    %48 = vector.load %arg8[%c0_23, %c0_24, %c0_25] : memref<1x128x128xf32, #tpu.memory_space<vmem>>, vector<1x128x128xf32>
    %49 = vector.shape_cast %48 : vector<1x128x128xf32> to vector<128x128xf32>
    %50 = vector.shape_cast %47 : vector<128x128xf32> to vector<1x128x128xf32>
    tpu.vector_store %arg8[%c0_23, %c0_24, %c0_25], %50 {strides = array<i32>} : memref<1x128x128xf32, #tpu.memory_space<vmem>>, vector<1x128x128xf32>,
    return
  }
  func.func @transform_0(%arg0: i32, %arg1: i32) -> (i32, i32, i32, i32) {
    %c0_i32 = arith.constant 0 : i32
    %c0_i32_0 = arith.constant 0 : i32
    %c0_i32_1 = arith.constant 0 : i32
    %c0_i32_2 = arith.constant 0 : i32
    return %arg0, %c0_i32, %c0_i32_0, %c0_i32_1 : i32, i32, i32, i32
  }
  func.func @transform_1(%arg0: i32, %arg1: i32) -> (i32, i32, i32) {
    %c0_i32 = arith.constant 0 : i32
    %c0_i32_0 = arith.constant 0 : i32
    %c0_i32_1 = arith.constant 0 : i32
    %c0_i32_2 = arith.constant 0 : i32
    return %c0_i32, %c0_i32_0, %c0_i32_1 : i32, i32, i32
  }
  func.func @transform_2(%arg0: i32, %arg1: i32) -> (i32, i32) {
    %c0_i32 = arith.constant 0 : i32
    %c0_i32_0 = arith.constant 0 : i32
    %c0_i32_1 = arith.constant 0 : i32
    return %c0_i32, %c0_i32_0 : i32, i32
  }
  func.func @transform_3(%arg0: i32, %arg1: i32) -> (i32, i32) {
    %c0_i32 = arith.constant 0 : i32
    %c0_i32_0 = arith.constant 0 : i32
    %c0_i32_1 = arith.constant 0 : i32
    return %c0_i32, %c0_i32_0 : i32, i32
  }
  func.func @transform_4(%arg0: i32, %arg1: i32) -> (i32, i32) {
    %c0_i32 = arith.constant 0 : i32
    %c0_i32_0 = arith.constant 0 : i32
    %c0_i32_1 = arith.constant 0 : i32
    return %c0_i32, %c0_i32_0 : i32, i32
  }
  func.func @transform_5(%arg0: i32, %arg1: i32) -> (i32, i32) {
    %c0_i32 = arith.constant 0 : i32
    %c0_i32_0 = arith.constant 0 : i32
    %c0_i32_1 = arith.constant 0 : i32
    return %c0_i32, %c0_i32_0 : i32, i32
  }
  func.func @transform_6(%arg0: i32, %arg1: i32) -> (i32, i32, i32) {
    %c0_i32 = arith.constant 0 : i32
    %c0_i32_0 = arith.constant 0 : i32
    return %arg0, %arg1, %c0_i32 : i32, i32, i32
  }
}

module attributes {stable_mosaic.version = 11 : i64} {
  func.func @_rpn_kernel(%arg0: i32, %arg1: i32, %arg2: memref<1x18x18x4xbf16, #tpu.memory_space<vmem>>, %arg3: memref<3x12x128xbf16, #tpu.memory_space<vmem>>, %arg4: memref<1x128xf32, #tpu.memory_space<vmem>>, %arg5: memref<128x128xbf16, #tpu.memory_space<vmem>>, %arg6: memref<1x128xf32, #tpu.memory_space<vmem>>, %arg7: memref<1x128xf32, #tpu.memory_space<vmem>>, %arg8: memref<1x128x128xf32, #tpu.memory_space<vmem>>) attributes {dimension_semantics = [#tpu.dimension_semantics<parallel>, #tpu.dimension_semantics<parallel>], iteration_bounds = array<i64: 2, 2>, scalar_prefetch = 0 : i64, scratch_operands = 0 : i64, tpu.core_type = #tpu.core_type<tc>, window_params = [{transform_indices = @transform_0, window_bounds = array<i64: 1, 18, 18, 4>}, {pipeline_mode = #tpu.pipeline_mode<synchronous>, transform_indices = @transform_1, window_bounds = array<i64: 3, 12, 128>}, {pipeline_mode = #tpu.pipeline_mode<synchronous>, transform_indices = @transform_2, window_bounds = array<i64: 1, 128>}, {pipeline_mode = #tpu.pipeline_mode<synchronous>, transform_indices = @transform_3, window_bounds = array<i64: 128, 128>}, {pipeline_mode = #tpu.pipeline_mode<synchronous>, transform_indices = @transform_4, window_bounds = array<i64: 1, 128>}, {pipeline_mode = #tpu.pipeline_mode<synchronous>, transform_indices = @transform_5, window_bounds = array<i64: 1, 128>}, {transform_indices = @transform_6, window_bounds = array<i64: 1, 128, 128>}]} {
    %c8_i32 = arith.constant 8 : i32
    %0 = arith.muli %arg1, %c8_i32 : i32
    %1 = tpu.assume_multiple %0, 8 : i32
    %c0 = arith.constant 0 : index
    %2 = arith.index_cast %1 : i32 to index
    %c0_0 = arith.constant 0 : index
    %c0_1 = arith.constant 0 : index
    %3 = vector.load %arg2[%c0, %2, %c0_0, %c0_1] : memref<1x18x18x4xbf16, #tpu.memory_space<vmem>>, vector<1x10x18x4xbf16>
    %4 = vector.shape_cast %3 : vector<1x10x18x4xbf16> to vector<10x18x4xbf16>
    %5 = vector.extract_strided_slice %4 {offsets = [0, 0, 0], sizes = [10, 16, 4], strides = [1, 1, 1]} : vector<10x18x4xbf16> to vector<10x16x4xbf16>
    %6 = vector.extract_strided_slice %4 {offsets = [0, 1, 0], sizes = [10, 16, 4], strides = [1, 1, 1]} : vector<10x18x4xbf16> to vector<10x16x4xbf16>
    %7 = vector.extract_strided_slice %4 {offsets = [0, 2, 0], sizes = [10, 16, 4], strides = [1, 1, 1]} : vector<10x18x4xbf16> to vector<10x16x4xbf16>
    %8 = tpu.concatenate %5, %6, %7 in 2 : vector<10x16x4xbf16>, vector<10x16x4xbf16>, vector<10x16x4xbf16> -> vector<10x16x12xbf16>
    %9 = vector.extract_strided_slice %8 {offsets = [0, 0, 0], sizes = [8, 16, 12], strides = [1, 1, 1]} : vector<10x16x12xbf16> to vector<8x16x12xbf16>
    %10 = vector.shape_cast %9 : vector<8x16x12xbf16> to vector<128x12xbf16>
    %c0_2 = arith.constant 0 : index
    %c0_3 = arith.constant 0 : index
    %c0_4 = arith.constant 0 : index
    %11 = vector.load %arg3[%c0_2, %c0_3, %c0_4] : memref<3x12x128xbf16, #tpu.memory_space<vmem>>, vector<1x12x128xbf16>
    %12 = vector.shape_cast %11 : vector<1x12x128xbf16> to vector<12x128xbf16>
    %cst = arith.constant dense<0.000000e+00> : vector<128x128xf32>
    %13 = tpu.matmul %10, %12, %cst {dimension_numbers = #tpu.dot_dimension_numbers<[1], [0], [0], [1], [0, 0, 1, 1], [], []>} : vector<128x12xbf16>, vector<12x128xbf16>, vector<128x128xf32> -> vector<128x128xf32>
    %14 = vector.extract_strided_slice %8 {offsets = [1, 0, 0], sizes = [8, 16, 12], strides = [1, 1, 1]} : vector<10x16x12xbf16> to vector<8x16x12xbf16>
    %15 = vector.shape_cast %14 : vector<8x16x12xbf16> to vector<128x12xbf16>
    %c1 = arith.constant 1 : index
    %c0_5 = arith.constant 0 : index
    %c0_6 = arith.constant 0 : index
    %16 = vector.load %arg3[%c1, %c0_5, %c0_6] : memref<3x12x128xbf16, #tpu.memory_space<vmem>>, vector<1x12x128xbf16>
    %17 = vector.shape_cast %16 : vector<1x12x128xbf16> to vector<12x128xbf16>
    %cst_7 = arith.constant dense<0.000000e+00> : vector<128x128xf32>
    %18 = tpu.matmul %15, %17, %cst_7 {dimension_numbers = #tpu.dot_dimension_numbers<[1], [0], [0], [1], [0, 0, 1, 1], [], []>} : vector<128x12xbf16>, vector<12x128xbf16>, vector<128x128xf32> -> vector<128x128xf32>
    %19 = arith.addf %13, %18 : vector<128x128xf32>
    %20 = vector.extract_strided_slice %8 {offsets = [2, 0, 0], sizes = [8, 16, 12], strides = [1, 1, 1]} : vector<10x16x12xbf16> to vector<8x16x12xbf16>
    %21 = vector.shape_cast %20 : vector<8x16x12xbf16> to vector<128x12xbf16>
    %c2 = arith.constant 2 : index
    %c0_8 = arith.constant 0 : index
    %c0_9 = arith.constant 0 : index
    %22 = vector.load %arg3[%c2, %c0_8, %c0_9] : memref<3x12x128xbf16, #tpu.memory_space<vmem>>, vector<1x12x128xbf16>
    %23 = vector.shape_cast %22 : vector<1x12x128xbf16> to vector<12x128xbf16>
    %cst_10 = arith.constant dense<0.000000e+00> : vector<128x128xf32>
    %24 = tpu.matmul %21, %23, %cst_10 {dimension_numbers = #tpu.dot_dimension_numbers<[1], [0], [0], [1], [0, 0, 1, 1], [], []>} : vector<128x12xbf16>, vector<12x128xbf16>, vector<128x128xf32> -> vector<128x128xf32>
    %25 = arith.addf %19, %24 : vector<128x128xf32>
    %c0_11 = arith.constant 0 : index
    %c0_12 = arith.constant 0 : index
    %26 = vector.load %arg4[%c0_11, %c0_12] : memref<1x128xf32, #tpu.memory_space<vmem>>, vector<1x128xf32>
    %27 = vector.broadcast %26 : vector<1x128xf32> to vector<128x128xf32>
    %28 = arith.addf %25, %27 : vector<128x128xf32>
    %cst_13 = arith.constant 0.000000e+00 : f32
    %29 = vector.broadcast %cst_13 : f32 to vector<128x128xf32>
    %30 = arith.maximumf %28, %29 : vector<128x128xf32>
    %31 = arith.truncf %30 : vector<128x128xf32> to vector<128x128xbf16>
    %c0_14 = arith.constant 0 : index
    %c0_15 = arith.constant 0 : index
    %32 = vector.load %arg5[%c0_14, %c0_15] : memref<128x128xbf16, #tpu.memory_space<vmem>>, vector<128x128xbf16>
    %cst_16 = arith.constant dense<0.000000e+00> : vector<128x128xf32>
    %33 = tpu.matmul %31, %32, %cst_16 {dimension_numbers = #tpu.dot_dimension_numbers<[1], [0], [0], [1], [0, 0, 1, 1], [], []>} : vector<128x128xbf16>, vector<128x128xbf16>, vector<128x128xf32> -> vector<128x128xf32>
    %c0_17 = arith.constant 0 : index
    %c0_18 = arith.constant 0 : index
    %34 = vector.load %arg6[%c0_17, %c0_18] : memref<1x128xf32, #tpu.memory_space<vmem>>, vector<1x128xf32>
    %35 = vector.broadcast %34 : vector<1x128xf32> to vector<128x128xf32>
    %36 = arith.addf %33, %35 : vector<128x128xf32>
    %c0_19 = arith.constant 0 : index
    %c0_20 = arith.constant 0 : index
    %37 = vector.load %arg7[%c0_19, %c0_20] : memref<1x128xf32, #tpu.memory_space<vmem>>, vector<1x128xf32>
    %cst_21 = arith.constant 0.000000e+00 : f32
    %38 = vector.broadcast %cst_21 : f32 to vector<1x128xf32>
    %39 = arith.cmpf ogt, %37, %38 : vector<1x128xf32>
    %40 = arith.negf %36 : vector<128x128xf32>
    %41 = math.exp %40 : vector<128x128xf32>
    %cst_22 = arith.constant 1.000000e+00 : f32
    %42 = vector.broadcast %cst_22 : f32 to vector<128x128xf32>
    %43 = arith.addf %42, %41 : vector<128x128xf32>
    %44 = arith.divf %42, %43 : vector<128x128xf32>
    %45 = vector.shape_cast %39 : vector<1x128xi1> to vector<1x128xi1>
    %46 = vector.broadcast %45 : vector<1x128xi1> to vector<128x128xi1>
    %47 = arith.select %46, %44, %36 : vector<128x128xi1>, vector<128x128xf32>
    %c0_23 = arith.constant 0 : index
    %c0_24 = arith.constant 0 : index
    %c0_25 = arith.constant 0 : index
    %48 = vector.load %arg8[%c0_23, %c0_24, %c0_25] : memref<1x128x128xf32, #tpu.memory_space<vmem>>, vector<1x128x128xf32>
    %49 = vector.shape_cast %48 : vector<1x128x128xf32> to vector<128x128xf32>
    %50 = vector.shape_cast %47 : vector<128x128xf32> to vector<1x128x128xf32>
    tpu.vector_store %arg8[%c0_23, %c0_24, %c0_25], %50 {strides = array<i32>} : memref<1x128x128xf32, #tpu.memory_space<vmem>>, vector<1x128x128xf32>,
    return
  }
  func.func @transform_0(%arg0: i32, %arg1: i32) -> (i32, i32, i32, i32) {
    %c0_i32 = arith.constant 0 : i32
    %c0_i32_0 = arith.constant 0 : i32
    %c0_i32_1 = arith.constant 0 : i32
    %c0_i32_2 = arith.constant 0 : i32
    return %arg0, %c0_i32, %c0_i32_0, %c0_i32_1 : i32, i32, i32, i32
  }
  func.func @transform_1(%arg0: i32, %arg1: i32) -> (i32, i32, i32) {
    %c0_i32 = arith.constant 0 : i32
    %c0_i32_0 = arith.constant 0 : i32
    %c0_i32_1 = arith.constant 0 : i32
    %c0_i32_2 = arith.constant 0 : i32
    return %c0_i32, %c0_i32_0, %c0_i32_1 : i32, i32, i32
  }
  func.func @transform_2(%arg0: i32, %arg1: i32) -> (i32, i32) {
    %c0_i32 = arith.constant 0 : i32
    %c0_i32_0 = arith.constant 0 : i32
    %c0_i32_1 = arith.constant 0 : i32
    return %c0_i32, %c0_i32_0 : i32, i32
  }
  func.func @transform_3(%arg0: i32, %arg1: i32) -> (i32, i32) {
    %c0_i32 = arith.constant 0 : i32
    %c0_i32_0 = arith.constant 0 : i32
    %c0_i32_1 = arith.constant 0 : i32
    return %c0_i32, %c0_i32_0 : i32, i32
  }
  func.func @transform_4(%arg0: i32, %arg1: i32) -> (i32, i32) {
    %c0_i32 = arith.constant 0 : i32
    %c0_i32_0 = arith.constant 0 : i32
    %c0_i32_1 = arith.constant 0 : i32
    return %c0_i32, %c0_i32_0 : i32, i32
  }
  func.func @transform_5(%arg0: i32, %arg1: i32) -> (i32, i32) {
    %c0_i32 = arith.constant 0 : i32
    %c0_i32_0 = arith.constant 0 : i32
    %c0_i32_1 = arith.constant 0 : i32
    return %c0_i32, %c0_i32_0 : i32, i32
  }
  func.func @transform_6(%arg0: i32, %arg1: i32) -> (i32, i32, i32) {
    %c0_i32 = arith.constant 0 : i32
    %c0_i32_0 = arith.constant 0 : i32
    return %arg0, %arg1, %c0_i32 : i32, i32, i32
  }
}

</mosaic_0001>

<bundles_post_ra>
// kernel: tpu_custom_call.1
= control target key start
LH: loop header
LB: loop body
LE: loop exit
PB: predicated region body
PF: predicated region fallthrough
CT: control target
= control target key end

     0   :  { %11 = vsyncpa [#allocation3], 0  ;;  %s2478_s0 = inlined_call_operand.vmem [shape: bf16[2,18,18,4], index: 0, kind: input, shape index: {}]   ;;  %s2479_s1 = inlined_call_operand.vmem [shape: bf16[3,12,128], index: 1, kind: input, shape index: {}]   ;;  %s2480_s2 = inlined_call_operand.vmem [shape: f32[1,128], index: 2, kind: input, shape index: {}]   ;;  %s2481_s3 = inlined_call_operand.vmem [shape: bf16[128,128], index: 3, kind: input, shape index: {}]   ;;  %s2482_s4 = inlined_call_operand.vmem [shape: f32[1,128], index: 4, kind: input, shape index: {}]   ;;  %s2483_s5 = inlined_call_operand.vmem [shape: f32[1,128], index: 5, kind: input, shape index: {}]   ;;  %s2484_s6 = inlined_call_operand.hbm [shape: f32[2,256,128], index: 6, kind: output, shape index: {}]  }
   0x1   :  { %13 = vsyncpa [#allocation3 + $0x1], 0  ;;  %s1951_s21 = smov 0   ;;  %s1953_s22 = smov 0  }
   0x2   :  { %s1955_s23 = smov 0   ;;  %s1957_s24 = smov 0  }
   0x3   :  { %s1959_s25 = smov 0   ;;  %s1961_s26 = smov 0  }
   0x4   :  { %s1963_s27 = smov 0   ;;  %s1965_s28 = smov 0  }
   0x5 LB: > { %s1420_s29 = sadd.s32 4294967295, %s1909_s28   ;;  %s1421_s30 = sadd.s32 4294967294, %s1909_s28   ;;  %s1909_s28 = sphi %s1965_s28, %s19_s28   ;;  %s1905_s27 = sphi %s1963_s27, %s2493_s27   ;;  %s1901_s26 = sphi %s1961_s26, %s2492_s26   ;;  %s1897_s25 = sphi %s1959_s25, %s2491_s25   ;;  %s1893_s24 = sphi %s1957_s24, %s2490_s24   ;;  %s1889_s23 = sphi %s1955_s23, %s2489_s23   ;;  %s1885_s22 = sphi %s1953_s22, %s2488_s22   ;;  %s1881_s21 = sphi %s1951_s21, %s2487_s21  }
   0x6   : > { %s28_s7 = sadd.s32 1, %s1901_s26  ;;  %s31_s8 = sadd.s32 1, %s1905_s27 }
   0x7   : > { %p29_p0 = scmp.ge.s32.totalorder %s28_s7, 2  ;;  %p181_p1 = scmp.ne.s32.totalorder %s1889_s23, %s1885_s22 }
   0x8   : > { %p182_p2 = scmp.eq.s32.totalorder %s1420_s29, 3  ;;  %p187_p5 = scmp.ne.s32.totalorder %s1885_s22, %s1881_s21 }
   0x9   : > { %s2495_s7 = smov (%p29_p0, %s28_s7), 0  ;;  %s2497_s8 = smov (!%p29_p0, %s31_s8), %s1905_s27 }
   0xa   : > { %s167_s9 = ssub.s32 %s1901_s26, %s2495_s7  ;;  %p2002_p3 = por %p182_p2, %p181_p1 }
   0xb   : > { %p33_p4 = scmp.ge.s32.totalorder %s2497_s8, 2  ;;  %p188_p6 = scmp.eq.s32.totalorder %s1421_s30, 3 }
   0xc   : > { %p1424_p7 = scmp.ge.s32.totalorder %s1909_s28, 1  ;;  %p229_p9 = scmp.lt.s32.totalorder %s1909_s28, 5 }
   0xd   : > { %s2499_s8 = smov (%p33_p4, %s2497_s8), 0  ;;  %p2011_p8 = por %p188_p6, %p187_p5 }
   0xe   : > { %s166_s12 = ssub.s32 %s1905_s27, %s2499_s8  ;;  %s171_s13 = sadd.s32 1, %s1889_s23 }
   0xf   : > { %s168_s14 = sor.u32 %s167_s9, %s166_s12  ;;  %p230_p10 = pnand %p1424_p7, %p229_p9 }
  0x10   : > { %p169_p11 = scmp.eq.s32.totalorder %s168_s14, 0  ;;  %p259_p12 = scmp.lt.s32.totalorder (!%p230_p10), %s1897_s25, 1 }
  0x11   : > { %233 = sbr.rel (%p230_p10) target bundleno = 670 (0x29e), region = 44  ;;  %s1912_s14 = smov (!%p230_p10), 4  }
  0x12   : > { %s2020_s15 = scalar_select %p169_p11, %s1889_s23, %s171_s13  }
  0x13   : > { %s1513_s16 = smul.u32 (!%p230_p10), 96, %s1893_s24  ;;  %s1911_s13 = smov (!%p230_p10), 8  }
  0x14   : > { %s256_s30 = sand.u32 (!%p230_p10), 1, %s1885_s22  }
  0x15   : > { %s2426_s29 = scalar_lea.sflag (!%p230_p10), [#allocation3], %s256_s30 }
  0x16   : > { %s260_s17 = scalar_select %p259_p12, %s1897_s25, 1  ;;  %vm521_vm0 = vcmask 1046528   ;;  %v1742_v0 = vld [vmem:[%s2479_s1 + $0x8] sm:$0x3f]   ;;  %vm641_vm1 = vcmask 1045504   ;;  %vm572_vm3 = vcmask 31744  }
  0x17   : > { %vm380_vm2 = vsmask.f32 7424  ;;  %1643 = vmatprep.subr.msk.bf16.mxu0 %vm641_vm1, %v1742_v0  ;;  %v643_v1 = vsel %vm641_vm1, %v1742_v0, 0  ;;  %vm593_vm4 = vcmask 64512   ;;  %vm624_vm5 = vcmask 97280  }
  0x18   : > { %s1646_s18 = smul.u32 216, %s260_s17  ;;  %1558 = vmatpush3.bf16.msra.mxu0 %v643_v1 }
  0x1a   : > { %s263_s9 = scalar_lea.vmem %s2478_s0, %s1646_s18 }
  0x1b   : > { %s2031_s12 = scalar_lea.vmem %s263_s9, %s1513_s16  ;;  %s1425_s9 = sshll.u32 %s256_s30, 7 }
  0x1c   : > { %v2036_v2 = vld [vmem:[%s2031_s12 + $0xc] sm:$0xff]   ;;  %v1723_v3 = vld [vmem:[%s2031_s12 + $0x14] ss:$0 sps:$4 sm:$0x11]   ;;  %v2040_v4 = vld [vmem:[%s2031_s12 + $0x18] sm:$0xff]   ;;  %s1509_s16 = sshll.u32 %s1897_s25, 5 }
  0x1d   : > { %v525_v5 = vrot.slane %v2036_v2, 1  ;;  %v526_v6 = vrot.slane %v1723_v3, 1  ;;  %v394_v7 = vshrl.u32 %v2036_v2, 16  ;;  %v396_v8 = vshll.u32 %v2036_v2, 16  ;;  %v2052_v19 = vld [vmem:[%s2031_s12 + $0x30] sm:$0xff]   ;;  %v2059_v27 = vld [vmem:[%s2031_s12 + $0x24] sm:$0xff]  }
  0x1e   : > { %v401_v9 = vshll.u32 %v1723_v3, 16  ;;  %v1725_v10 = vld [vmem:[%s2031_s12 + $0x20] ss:$0 sps:$4 sm:$0x11]   ;;  %v528_v11 = vrot.slane %v2040_v4, 1  ;;  %v406_v12 = vshrl.u32 %v2040_v4, 16 }
  0x1f   : > { %v527_v13 = vsel %vm521_vm0, %v525_v5, %v526_v6  ;;  %v398_v14 = vrot.slane %v396_v8, 1  ;;  %v408_v15 = vshll.u32 %v2040_v4, 16  ;;  %v529_v17 = vrot.slane %v1725_v10, 1  ;;  %v1727_v22 = vld [vmem:[%s2031_s12 + $0x38] ss:$0 sps:$4 sm:$0x11]  }
  0x20   : > { %554 = vrot.lane.b32.xlu1 %v527_v13, %s1911_s13  ;;  %v403_v16 = vrot.slane %v401_v9, 1  ;;  %v413_v18 = vshll.u32 %v1725_v10, 16  ;;  %v430_v25 = vshrl.u32 %v2052_v19, 16  ;;  %v432_v26 = vshll.u32 %v2052_v19, 16  ;;  %v2064_v32 = vld [vmem:[%s2031_s12 + $0x48] sm:$0xff]   ;;  %v2073_v41 = vld [vmem:[%s2031_s12 + $0x3c] sm:$0xff]  }
  0x21   : > { %v399_v20 = vor.u32 %v398_v14, %v394_v7  ;;  %v410_v21 = vrot.slane %v408_v15, 1  ;;  %v530_v23 = vsel %vm521_vm0, %v528_v11, %v529_v17  ;;  %v437_v30 = vshll.u32 %v1727_v22, 16  ;;  %v1729_v31 = vld [vmem:[%s2031_s12 + $0x2c] ss:$0 sps:$4 sm:$0x11]   ;;  %v2088_v59 = vld [vmem:[%s2031_s12 + $0x60] sm:$0xff]  }
  0x22   : > { %v415_v24 = vrot.slane %v413_v18, 1  ;;  %v434_v33 = vrot.slane %v432_v26, 1  ;;  %v418_v34 = vshrl.u32 %v2059_v27, 16  ;;  %v420_v35 = vshll.u32 %v2059_v27, 16  ;;  %v2091_v0 = vld [vmem:[%s2031_s12 + $0x54] sm:$0xff]   ;;  %v2102_v13 = vld [vmem:[%s2031_s12] sm:$0xff]  }
  0x23   : > { %v404_v28 = vsel %vm380_vm2, %v399_v20, %v403_v16  ;;  %v411_v29 = vor.u32 %v410_v21, %v406_v12  ;;  %v534_v36 = vrot.slane %v2052_v19, 1  ;;  %v439_v38 = vrot.slane %v437_v30, 1  ;;  %v1731_v46 = vld [vmem:[%s2031_s12 + $0x50] ss:$0 sps:$4 sm:$0x11]  }
  0x24   : > { %503 = vrot.lane.b32.xlu0 %v404_v28, %s1912_s14  ;;  %556 = vrot.lane.b32.xlu1 %v530_v23, %s1911_s13  ;;  %v425_v39 = vshll.u32 %v1729_v31, 16  ;;  %v535_v40 = vrot.slane %v1727_v22, 1  ;;  %v435_v42 = vor.u32 %v434_v33, %v430_v25  ;;  %v422_v43 = vrot.slane %v420_v35, 1  ;;  %v1733_v55 = vld [vmem:[%s2031_s12 + $0x44] ss:$0 sps:$4 sm:$0x11]  }
  0x25   : > { %v416_v37 = vsel %vm380_vm2, %v411_v29, %v415_v24  ;;  %v531_v44 = vrot.slane %v2059_v27, 1  ;;  %v454_v47 = vshrl.u32 %v2064_v32, 16  ;;  %v456_v48 = vshll.u32 %v2064_v32, 16  ;;  %v1735_v3 = vld [vmem:[%s2031_s12 + $0x68] ss:$0 sps:$4 sm:$0x11]  }
  0x26   : > { %v427_v45 = vrot.slane %v425_v39, 1  ;;  %v440_v49 = vsel %vm380_vm2, %v435_v42, %v439_v38  ;;  %v423_v50 = vor.u32 %v422_v43, %v418_v34  ;;  %v532_v51 = vrot.slane %v1729_v31, 1  ;;  %v1737_v14 = vld [vmem:[%s2031_s12 + $0x5c] ss:$0 sps:$4 sm:$0x11]   ;;  %v2121_v39 = vld [vmem:[%s2031_s12 + $0x6c] sm:$0xff]  }
  0x27   : > { %v442_v52 = vshrl.u32 %v2073_v41, 16  ;;  %v458_v53 = vrot.slane %v456_v48, 1  ;;  %v461_v54 = vshll.u32 %v1731_v46, 16  ;;  %v444_v56 = vshll.u32 %v2073_v41, 16 }
  0x28   : > { %505 = vrot.lane.b32.xlu0 %v416_v37, %s1912_s14  ;;  %509 = vrot.lane.b32.xlu1 %v440_v49, %s1912_s14  ;;  %v428_v57 = vsel %vm380_vm2, %v423_v50, %v427_v45  ;;  %v536_v58 = vsel %vm521_vm0, %v534_v36, %v535_v40  ;;  %v449_v63 = vshll.u32 %v1733_v55, 16  ;;  %v540_v1 = vrot.slane %v2064_v32, 1  ;;  %v1739_v28 = vld [vmem:[%s2031_s12 + $0x8] ss:$0 sps:$4 sm:$0x11]  }
  0x29   : > { %v459_v60 = vor.u32 %v458_v53, %v454_v47  ;;  %v463_v61 = vrot.slane %v461_v54, 1  ;;  %v446_v62 = vrot.slane %v444_v56, 1  ;;  %v533_v5 = vsel %vm521_vm0, %v531_v44, %v532_v51  ;;  %v1743_v44 = vld [vmem:[%s2479_s1 + $0x10] sm:$0x3f]   ;;  %v1744_v45 = vld [vmem:[%s2479_s1] sm:$0x3f]  }
  0x2a   : > { %v451_v7 = vrot.slane %v449_v63, 1  ;;  %v541_v8 = vrot.slane %v1731_v46, 1  ;;  %v478_v10 = vshrl.u32 %v2088_v59, 16  ;;  %v480_v11 = vshll.u32 %v2088_v59, 16  ;;  %1645 = vmatprep.subr.msk.bf16.mxu0 %vm641_vm1, %v1743_v44  ;;  %1644 = vmatprep.subr.msk.bf16.mxu1 %vm641_vm1, %v1744_v45 }
  0x2b   : > { %v447_v6 = vor.u32 %v446_v62, %v442_v52  ;;  %v464_v9 = vsel %vm380_vm2, %v459_v60, %v463_v61  ;;  %v485_v12 = vshll.u32 %v1735_v3, 16  ;;  %v468_v15 = vshll.u32 %v2091_v0, 16  ;;  %v1741_v47 = vld [vmem:[%s2031_s12 + $0x74] ss:$0 sps:$4 sm:$0x11]   ;;  %s2351_s12 = scalar_lea.vmem [#allocation2], %s1425_s9 }
  0x2c   : > { %507 = vrot.lane.b32.xlu0 %v428_v57, %s1912_s14  ;;  %560 = vrot.lane.b32.xlu1 %v536_v58, %s1911_s13  ;;  %v537_v16 = vrot.slane %v2073_v41, 1  ;;  %v538_v17 = vrot.slane %v1733_v55, 1  ;;  %v482_v18 = vrot.slane %v480_v11, 1  ;;  %v466_v20 = vshrl.u32 %v2091_v0, 16  ;;  %s1342_s25 = sshll.u32 %s2351_s12, 4  ;;  %s2418_s25 = int_to_ptr.vmem [resolvable:$true] %s1342_s25 }
  0x2d   : > { %v452_v21 = vsel %vm380_vm2, %v447_v6, %v451_v7  ;;  %v487_v22 = vrot.slane %v485_v12, 1  ;;  %v470_v23 = vrot.slane %v468_v15, 1  ;;  %v473_v24 = vshll.u32 %v1737_v14, 16  ;;  %s1817_s9 = scalar_lea.vmem %s2418_s25, 2048 }
  0x2e   : > { %v542_v25 = vsel %vm521_vm0, %v540_v1, %v541_v8  ;;  %v483_v26 = vor.u32 %v482_v18, %v478_v10  ;;  %v384_v29 = vshll.u32 %v2102_v13, 16  ;;  %v539_v30 = vsel %vm521_vm0, %v537_v16, %v538_v17  ;;  %p1818_p13 = scmp.ne.s32.totalorder %s2418_s25, %s1817_s9 }
  0x2f   : > { %v546_v31 = vrot.slane %v2088_v59, 1  ;;  %v547_v33 = vrot.slane %v1735_v3, 1  ;;  %v543_v34 = vrot.slane %v2091_v0, 1  ;;  %v471_v35 = vor.u32 %v470_v23, %v466_v20 }
  0x30   : > { %558 = vrot.lane.b32.xlu0 %v533_v5, %s1911_s13  ;;  %513 = vrot.lane.b32.xlu1 %v464_v9, %s1912_s14  ;;  %v475_v36 = vrot.slane %v473_v24, 1  ;;  %v544_v37 = vrot.slane %v1737_v14, 1  ;;  %v382_v38 = vshrl.u32 %v2102_v13, 16  ;;  %v488_v40 = vsel %vm380_vm2, %v483_v26, %v487_v22  ;;  %p1819_p0 = pnand %p1818_p13, %p2002_p3 }
  0x31   : > { %v386_v42 = vrot.slane %v384_v29, 1  ;;  %v522_v43 = vrot.slane %v2102_v13, 1  ;;  %v389_v46 = vshll.u32 %v1739_v28, 16  ;;  %v860_v48 = vsel %vm641_vm1, %v1743_v44, 0 }
  0x32   : > { %v750_v49 = vsel %vm641_vm1, %v1744_v45, 0  ;;  %v476_v50 = vsel %vm380_vm2, %v471_v35, %v475_v36  ;;  %v523_v51 = vrot.slane %v1739_v28, 1  ;;  %v492_v52 = vshll.u32 %v2121_v39, 16  ;;  %v1745_v45 = vld [vmem:[%s2481_s3 + $0x38] sm:$0xff]   ;;  %p1820_p1 = pneg %p1819_p0 }
  0x33   : > { %v548_v53 = vsel %vm521_vm0, %v546_v31, %v547_v33  ;;  %1576 = vmatpush3.bf16.msra.mxu1 %v750_v49  ;;  %v545_v54 = vsel %vm521_vm0, %v543_v34, %v544_v37  ;;  %v490_v55 = vshrl.u32 %v2121_v39, 16  ;;  %v387_v56 = vor.u32 %v386_v42, %v382_v38  ;;  %v1750_v49 = vld [vmem:[%s2481_s3 + $0x10] sm:$0xff]  }
  0x34   : > { %511 = vrot.lane.b32.xlu0 %v452_v21, %s1912_s14  ;;  %564 = vrot.lane.b32.xlu1 %v542_v25, %s1911_s13  ;;  %v391_v57 = vrot.slane %v389_v46, 1  ;;  %v494_v58 = vrot.slane %v492_v52, 1  ;;  %v497_v60 = vshll.u32 %v1741_v47, 16  ;;  %v524_v61 = vsel %vm521_vm0, %v522_v43, %v523_v51  ;;  %v1746_v46 = vld [vmem:[%s2481_s3 + $0x30] sm:$0xff]   ;;  %v1752_v51 = vld [vmem:[%s2481_s3] sm:$0xff]  }
  0x35   : > { %v549_v62 = vrot.slane %v2121_v39, 1  ;;  %v550_v63 = vrot.slane %v1741_v47, 1  ;;  %1611 = vmatprep.subr.bf16.mxu1 %v1745_v45  ;;  %v1748_v47 = vld [vmem:[%s2481_s3 + $0x20] sm:$0xff]  }
  0x36   : > { %v392_v1 = vsel %vm380_vm2, %v387_v56, %v391_v57  ;;  %v495_v3 = vor.u32 %v494_v58, %v490_v55  ;;  %v499_v5 = vrot.slane %v497_v60, 1 }
  0x37   : > { %v551_v6 = vsel %vm521_vm0, %v549_v62, %v550_v63 }
  0x38   : > { %562 = vrot.lane.b32.xlu0 %v539_v30, %s1911_s13  ;;  %517 = vrot.lane.b32.xlu1 %v488_v40, %s1912_s14  ;;  %v500_v7 = vsel %vm380_vm2, %v495_v3, %v499_v5 }
  0x3c   : > { %515 = vrot.lane.b32.xlu0 %v476_v50, %s1912_s14  ;;  %568 = vrot.lane.b32.xlu1 %v548_v53, %s1911_s13  ;;  %v1751_v50 = vld [vmem:[%s2481_s3 + $0x8] sm:$0xff]  }
  0x40   : > { %566 = vrot.lane.b32.xlu0 %v545_v54, %s1911_s13  ;;  %552 = vrot.lane.b32.xlu1 %v524_v61, %s1911_s13 }
  0x44   : > { %501 = vrot.lane.b32.xlu0 %v392_v1, %s1912_s14  ;;  %570 = vrot.lane.b32.xlu1 %v551_v6, %s1911_s13 }
  0x48   : > { %519 = vrot.lane.b32.xlu0 %v500_v7, %s1912_s14  ;;  %s1508_s14 = sshll.u32 %s1893_s24, 4 }
  0x49   : > { %s1339_s17 = sadd.s32 %s1509_s16, %s1508_s14  ;;  %s1914_s14 = smov [#allocation2]  }
  0x4a   : > { %s1510_s24 = sshll.u32 %s1339_s17, 7  ;;  %s1821_s16 = sshll.u32 %s1914_s14, 4  ;;  %s1822_s16 = int_to_ptr.vmem [resolvable:$false] %s1821_s16 }
  0x4b   : > { %s2415_s20 = scalar_lea.hbm %s2484_s6, %s1510_s24  ;;  %s1823_s17 = scalar_lea.vmem %s1822_s16, 4096 }
  0x4c   : > { %p1824_p2 = scmp.lt.s32.totalorder %s2418_s25, %s1822_s16  ;;  %p1825_p4 = scmp.lt.s32.totalorder %s1823_s17, %s1817_s9 }
  0x4e   : > { %p1826_p5 = por %p1825_p4, %p1824_p2 }
  0x50   : > { %p1827_p6 = pnand %p1826_p5, %p1820_p1 }
  0x92   : > { %v555_v8 = vpop.permute.xlu1 %554 }
  0x96   : > { %v504_v9 = vpop.permute.xlu0 %503  ;;  %v557_v10 = vpop.permute.xlu1 %556 }
  0x97   : > { %v576_v11 = vsel %vm572_vm3, %v2036_v2, %v504_v9 }
  0x98   : > { %v597_v12 = vsel %vm593_vm4, %v576_v11, %v555_v8 }
  0x99   : > { %1559 = vmatprep.mubr.msk.bf16.mxu0 %vm624_vm5, %v597_v12 }
  0x9a   : > { %v506_v14 = vpop.permute.xlu0 %505  ;;  %v510_v16 = vpop.permute.xlu1 %509 }
  0x9b   : > { %v578_v15 = vsel %vm572_vm3, %v2040_v4, %v506_v14  ;;  %v582_v21 = vsel %vm572_vm3, %v2052_v19, %v510_v16 }
  0x9c   : > { %v599_v17 = vsel %vm593_vm4, %v578_v15, %v557_v10 }
  0x9d   : > { %1560 = vmatmul.mubr.msk.bf16.vlgmr.msra.gmra.mxu0 %vm624_vm5, %v599_v17 }
  0x9e   : > { %1594 = vmatpush3.bf16.msra.mxu0 %v860_v48  ;;  %v508_v18 = vpop.permute.xlu0 %507  ;;  %v561_v20 = vpop.permute.xlu1 %560  ;;  %v1749_v48 = vld [vmem:[%s2481_s3 + $0x18] sm:$0xff]  }
  0x9f   : > { %v580_v2 = vsel %vm572_vm3, %v2059_v27, %v508_v18  ;;  %v603_v4 = vsel %vm593_vm4, %v582_v21, %v561_v20 }
  0xa2   : > { %v559_v22 = vpop.permute.xlu0 %558  ;;  %v514_v24 = vpop.permute.xlu1 %513 }
  0xa3   : > { %v601_v23 = vsel %vm593_vm4, %v580_v2, %v559_v22  ;;  %v586_v28 = vsel %vm572_vm3, %v2064_v32, %v514_v24  ;;  %v2246_v22 = vld [vmem:[%s2480_s2] ss:$0 sm:$0xff] }
  0xa4   : > { %1563 = vmatprep.mubr.msk.bf16.mxu0 %vm624_vm5, %v601_v23 }
  0xa5   : > { %1564 = vmatmul.mubr.msk.bf16.gmra.mxu0 %vm624_vm5, %v603_v4 }
  0xa6   : > { %v512_v25 = vpop.permute.xlu0 %511  ;;  %v565_v26 = vpop.permute.xlu1 %564 }
  0xa7   : > { %v584_v19 = vsel %vm572_vm3, %v2073_v41, %v512_v25  ;;  %v607_v31 = vsel %vm593_vm4, %v586_v28, %v565_v26 }
  0xaa   : > { %v563_v29 = vpop.permute.xlu0 %562  ;;  %v518_v30 = vpop.permute.xlu1 %517 }
  0xab   : > { %v605_v27 = vsel %vm593_vm4, %v584_v19, %v563_v29  ;;  %v590_v34 = vsel %vm572_vm3, %v2088_v59, %v518_v30 }
  0xac   : > { %1567 = vmatprep.mubr.msk.bf16.mxu0 %vm624_vm5, %v605_v27 }
  0xad   : > { %1568 = vmatmul.mubr.msk.bf16.gmra.mxu0 %vm624_vm5, %v607_v31 }
  0xae   : > { %v516_v33 = vpop.permute.xlu0 %515  ;;  %v569_v35 = vpop.permute.xlu1 %568 }
  0xaf   : > { %v588_v32 = vsel %vm572_vm3, %v2091_v0, %v516_v33  ;;  %v611_v37 = vsel %vm593_vm4, %v590_v34, %v569_v35 }
  0xb2   : > { %v567_v36 = vpop.permute.xlu0 %566  ;;  %v553_v38 = vpop.permute.xlu1 %552 }
  0xb3   : > { %v609_v41 = vsel %vm593_vm4, %v588_v32, %v567_v36 }
  0xb4   : > { %1571 = vmatprep.mubr.msk.bf16.mxu0 %vm624_vm5, %v609_v41 }
  0xb5   : > { %1572 = vmatmul.mubr.msk.bf16.gmra.mxu0 %vm624_vm5, %v611_v37 }
  0xb6   : > { %1595 = vmatprep.mubr.msk.bf16.mxu0 %vm624_vm5, %v599_v17  ;;  %v502_v40 = vpop.permute.xlu0 %501  ;;  %v571_v43 = vpop.permute.xlu1 %570 }
  0xb7   : > { %v574_v59 = vsel %vm572_vm3, %v2102_v13, %v502_v40 }
  0xb8   : > { %v595_v42 = vsel %vm593_vm4, %v574_v59, %v553_v38 }
  0xb9   : > { %1577 = vmatprep.mubr.msk.bf16.mxu1 %vm624_vm5, %v595_v42 }
  0xba   : > { %1578 = vmatmul.mubr.msk.bf16.vlgmr.msra.gmra.mxu1 %vm624_vm5, %v597_v12  ;;  %v520_v0 = vpop.permute.xlu0 %519 }
  0xbb   : > { %1581 = vmatprep.mubr.msk.bf16.mxu1 %vm624_vm5, %v599_v17  ;;  %v592_v13 = vsel %vm572_vm3, %v2121_v39, %v520_v0  ;;  %1612 = vmatpush3.bf16.msra.mxu1 %v1745_v45  ;;  %v1747_v39 = vld [vmem:[%s2481_s3 + $0x28] sm:$0xff]  }
  0xbc   : > { %v613_v44 = vsel %vm593_vm4, %v592_v13, %v571_v43  ;;  %1613 = vmatprep.subr.bf16.mxu1 %v1746_v46 }
  0xbd   : > { %1596 = vmatmul.mubr.msk.bf16.vlgmr.msra.gmra.mxu0 %vm624_vm5, %v601_v23 }
  0xbe   : > { %1599 = vmatprep.mubr.msk.bf16.mxu0 %vm624_vm5, %v603_v4 }
  0xbf   : > { %1614 = vmatpush3.bf16.msra.mxu1 %v1746_v46 }
  0xc0   : > { %1615 = vmatprep.subr.bf16.mxu1 %v1747_v39 }
  0xc2   : > { %1582 = vmatmul.mubr.msk.bf16.gmra.mxu1 %vm624_vm5, %v601_v23 }
  0xc3   : > { %1585 = vmatprep.mubr.msk.bf16.mxu1 %vm624_vm5, %v603_v4  ;;  %1616 = vmatpush3.bf16.msra.mxu1 %v1747_v39 }
  0xc4   : > { %1617 = vmatprep.subr.bf16.mxu1 %v1748_v47 }
  0xc5   : > { %1600 = vmatmul.mubr.msk.bf16.gmra.mxu0 %vm624_vm5, %v605_v27 }
  0xc6   : > { %1603 = vmatprep.mubr.msk.bf16.mxu0 %vm624_vm5, %v607_v31 }
  0xc7   : > { %1618 = vmatpush3.bf16.msra.mxu1 %v1748_v47 }
  0xc8   : > { %1619 = vmatprep.subr.bf16.mxu1 %v1749_v48 }
  0xca   : > { %1586 = vmatmul.mubr.msk.bf16.gmra.mxu1 %vm624_vm5, %v605_v27 }
  0xcb   : > { %1589 = vmatprep.mubr.msk.bf16.mxu1 %vm624_vm5, %v607_v31  ;;  %1620 = vmatpush3.bf16.msra.mxu1 %v1749_v48 }
  0xcc   : > { %1621 = vmatprep.subr.bf16.mxu1 %v1750_v49 }
  0xcd   : > { %1604 = vmatmul.mubr.msk.bf16.gmra.mxu0 %vm624_vm5, %v609_v41 }
  0xce   : > { %1607 = vmatprep.mubr.msk.bf16.mxu0 %vm624_vm5, %v611_v37 }
  0xcf   : > { %1622 = vmatpush3.bf16.msra.mxu1 %v1750_v49 }
  0xd0   : > { %1623 = vmatprep.subr.bf16.mxu1 %v1751_v50 }
  0xd2   : > { %1590 = vmatmul.mubr.msk.bf16.gmra.mxu1 %vm624_vm5, %v609_v41 }
  0xd3   : > { %1624 = vmatpush3.bf16.msra.mxu1 %v1751_v50 }
  0xd4   : > { %1625 = vmatprep.subr.bf16.mxu1 %v1752_v51 }
  0xd5   : > { %1608 = vmatmul.mubr.msk.bf16.gmra.mxu0 %vm624_vm5, %v613_v44 }
  0xd7   : > { %1626 = vmatpush3.bf16.msra.mxu1 %v1752_v51 }
 0x15d   : > { %v1561_v52 = vpop.f32.mrf.mxu0 }
 0x15f   : > { %v679_v53 = vpop.f32.mrf.mxu0 }
 0x161   : > { %v1562_v54 = vpop.f32.mrf.mxu0 }
 0x163   : > { %v682_v55 = vpop.f32.mrf.mxu0 }
 0x165   : > { %v1565_v56 = vpop.f32.mrf.mxu0 }
 0x167   : > { %v695_v57 = vpop.f32.mrf.mxu0 }
 0x169   : > { %v1566_v58 = vpop.f32.mrf.mxu0 }
 0x16b   : > { %v698_v60 = vpop.f32.mrf.mxu0 }
 0x16d   : > { %v1569_v61 = vpop.f32.mrf.mxu0 }
 0x16f   : > { %v711_v62 = vpop.f32.mrf.mxu0 }
 0x171   : > { %v1570_v63 = vpop.f32.mrf.mxu0 }
 0x173   : > { %v2233_v1 = vpop.f32.mrf.mxu0 }
 0x175   : > { %v2235_v3 = vpop.f32.mrf.mxu0 }
 0x177   : > { %v2237_v5 = vpop.f32.mrf.mxu0 }
 0x179   : > { %v2239_v6 = vpop.f32.mrf.mxu0 }
 0x17a   : > { %v1579_v7 = vpop.f32.mrf.mxu1 }
 0x17b   : > { %v2241_v8 = vpop.f32.mrf.mxu0  ;;  %v795_v10 = vadd.f32 %v1579_v7, %v1561_v52 }
 0x17c   : > { %v786_v9 = vpop.f32.mrf.mxu1 }
 0x17d   : > { %v787_v11 = vadd.f32 %v786_v9, %v679_v53  ;;  %v1597_v12 = vpop.f32.mrf.mxu0 }
 0x17e   : > { %v1580_v14 = vpop.f32.mrf.mxu1  ;;  %v961_v20 = vadd.f32 %v1597_v12, %v795_v10 }
 0x17f   : > { %v798_v15 = vadd.f32 %v1580_v14, %v1562_v54  ;;  %v896_v16 = vpop.f32.mrf.mxu0 }
 0x180   : > { %v959_v17 = vadd.f32 %v896_v16, %v787_v11  ;;  %v789_v18 = vpop.f32.mrf.mxu1  ;;  %v984_v29 = vadd.f32 %v2246_v22, %v961_v20 }
 0x181   : > { %v790_v21 = vadd.f32 %v789_v18, %v682_v55  ;;  %v1598_v2 = vpop.f32.mrf.mxu0 }
 0x182   : > { %v962_v23 = vadd.f32 %v1598_v2, %v798_v15  ;;  %v1583_v24 = vpop.f32.mrf.mxu1  ;;  %v982_v25 = vadd.f32 %v2246_v22, %v959_v17  ;;  %v1000_v59 = vmax.f32 %v984_v29, 0.0 }
 0x183   : > { %v899_v4 = vpop.f32.mrf.mxu0  ;;  %v811_v27 = vadd.f32 %v1583_v24, %v1565_v56 }
 0x184   : > { %v985_v26 = vadd.f32 %v2246_v22, %v962_v23  ;;  %v960_v28 = vadd.f32 %v899_v4, %v790_v21  ;;  %v802_v19 = vpop.f32.mrf.mxu1  ;;  %v998_v41 = vmax.f32 %v982_v25, 0.0 }
 0x185   : > { %v803_v30 = vadd.f32 %v802_v19, %v695_v57  ;;  %v1601_v31 = vpop.f32.mrf.mxu0 }
 0x186   : > { %v983_v33 = vadd.f32 %v2246_v22, %v960_v28  ;;  %v1584_v34 = vpop.f32.mrf.mxu1  ;;  %v1001_v35 = vmax.f32 %v985_v26, 0.0  ;;  %v965_v42 = vadd.f32 %v1601_v31, %v811_v27 }
 0x187   : > { %v814_v32 = vadd.f32 %v1584_v34, %v1566_v58  ;;  %v912_v36 = vpop.f32.mrf.mxu0 }
 0x188   : > { %v999_v37 = vmax.f32 %v983_v33, 0.0  ;;  %v963_v38 = vadd.f32 %v912_v36, %v803_v30  ;;  %v805_v40 = vpop.f32.mrf.mxu1  ;;  %v1015_v46 = vpack.c.bf16 %v1001_v35, %v1000_v59  ;;  %v988_v51 = vadd.f32 %v2246_v22, %v965_v42 }
 0x189   : > { %v806_v0 = vadd.f32 %v805_v40, %v698_v60  ;;  %v1602_v13 = vpop.f32.mrf.mxu0 }
 0x18a   : > { %v966_v43 = vadd.f32 %v1602_v13, %v814_v32  ;;  %v1587_v44 = vpop.f32.mrf.mxu1  ;;  %v1014_v45 = vpack.c.bf16 %v999_v37, %v998_v41  ;;  %v986_v47 = vadd.f32 %v2246_v22, %v963_v38  ;;  %v1004_v12 = vmax.f32 %v988_v51, 0.0 }
 0x18b   : > { %v915_v39 = vpop.f32.mrf.mxu0  ;;  %v827_v52 = vadd.f32 %v1587_v44, %v1569_v61 }
 0x18c   : > { %v989_v48 = vadd.f32 %v2246_v22, %v966_v43  ;;  %v964_v49 = vadd.f32 %v915_v39, %v806_v0  ;;  %v818_v50 = vpop.f32.mrf.mxu1  ;;  %1627 = vmatprep.mubr.bf16.mxu1 %v1014_v45  ;;  %v1002_v7 = vmax.f32 %v986_v47, 0.0  ;;  %v2272_v39 = vld [vmem:[%s2482_s4] ss:$0 sm:$0xff] }
 0x18d   : > { %v819_v53 = vadd.f32 %v818_v50, %v711_v62  ;;  %v1605_v54 = vpop.f32.mrf.mxu0  ;;  %1628 = vmatmul.mubr.bf16.vlgmr.msra.gmra.mxu1 %v1015_v46 }
 0x18e   : > { %v987_v55 = vadd.f32 %v2246_v22, %v964_v49  ;;  %v1588_v56 = vpop.f32.mrf.mxu1  ;;  %v1005_v57 = vmax.f32 %v989_v48, 0.0  ;;  %v969_v14 = vadd.f32 %v1605_v54, %v827_v52 }
 0x18f   : > { %v830_v58 = vadd.f32 %v1588_v56, %v1570_v63  ;;  %v928_v60 = vpop.f32.mrf.mxu0 }
 0x190   : > { %v1003_v9 = vmax.f32 %v987_v55, 0.0  ;;  %v967_v10 = vadd.f32 %v928_v60, %v819_v53  ;;  %v821_v11 = vpop.f32.mrf.mxu1  ;;  %v1017_v20 = vpack.c.bf16 %v1005_v57, %v1004_v12  ;;  %v992_v24 = vadd.f32 %v2246_v22, %v969_v14 }
 0x191   : > { %v822_v15 = vadd.f32 %v821_v11, %v2233_v1  ;;  %v1606_v16 = vpop.f32.mrf.mxu0 }
 0x192   : > { %v970_v17 = vadd.f32 %v1606_v16, %v830_v58  ;;  %v1591_v61 = vpop.f32.mrf.mxu1  ;;  %v1016_v62 = vpack.c.bf16 %v1003_v9, %v1002_v7  ;;  %v990_v21 = vadd.f32 %v2246_v22, %v967_v10  ;;  %v1008_v35 = vmax.f32 %v992_v24, 0.0 }
 0x193   : > { %v931_v18 = vpop.f32.mrf.mxu0  ;;  %v843_v4 = vadd.f32 %v1591_v61, %v2235_v3  ;;  %v1289_v61 = vlaneseq }
 0x194   : > { %v993_v2 = vadd.f32 %v2246_v22, %v970_v17  ;;  %v968_v63 = vadd.f32 %v931_v18, %v822_v15  ;;  %v834_v23 = vpop.f32.mrf.mxu1  ;;  %1631 = vmatprep.mubr.bf16.mxu1 %v1016_v62  ;;  %v1006_v30 = vmax.f32 %v990_v21, 0.0  ;;  %v1190_v18 = vld [vmem:[%s2483_s5] sm:$0x1] }
 0x195   : > { %v835_v25 = vadd.f32 %v834_v23, %v2237_v5  ;;  %v1609_v1 = vpop.f32.mrf.mxu0  ;;  %1632 = vmatmul.mubr.bf16.gmra.mxu1 %v1017_v20  ;;  %vm1191_vm6 = vcmp.gt.f32.partialorder %v1190_v18, 0.0 }
 0x196   : > { %v991_v26 = vadd.f32 %v2246_v22, %v968_v63  ;;  %v1592_v28 = vpop.f32.mrf.mxu1  ;;  %v1009_v19 = vmax.f32 %v993_v2, 0.0  ;;  %v973_v32 = vadd.f32 %v1609_v1, %v843_v4  ;;  %v1290_v1 = vshrl.u32 %v1289_v61, 7 }
 0x197   : > { %v846_v29 = vadd.f32 %v1592_v28, %v2239_v6  ;;  %v944_v27 = vpop.f32.mrf.mxu0 }
 0x198   : > { %v1007_v31 = vmax.f32 %v991_v26, 0.0  ;;  %v971_v33 = vadd.f32 %v944_v27, %v835_v25  ;;  %v837_v34 = vpop.f32.mrf.mxu1  ;;  %v1019_v38 = vpack.c.bf16 %v1009_v19, %v1008_v35  ;;  %v996_v6 = vadd.f32 %v2246_v22, %v973_v32 }
 0x199   : > { %v838_v36 = vadd.f32 %v837_v34, %v2241_v8  ;;  %v1610_v3 = vpop.f32.mrf.mxu0  ;;  %v1913_v32 = vmov 0  }
 0x19a   : > { %v974_v41 = vadd.f32 %v1610_v3, %v846_v29  ;;  %v1018_v5 = vpack.c.bf16 %v1007_v31, %v1006_v30  ;;  %v994_v40 = vadd.f32 %v2246_v22, %v971_v33  ;;  %v1012_v8 = vmax.f32 %v996_v6, 0.0 }
 0x19b   : > { %v947_v37 = vpop.f32.mrf.mxu0  ;;  %v1291_v3 = vsub.s32 0, %v1290_v1 }
 0x19c   : > { %v997_v59 = vadd.f32 %v2246_v22, %v974_v41  ;;  %v972_v42 = vadd.f32 %v947_v37, %v838_v36  ;;  %1635 = vmatprep.mubr.bf16.mxu1 %v1018_v5  ;;  %v1010_v43 = vmax.f32 %v994_v40, 0.0  ;;  %v1288_v36 = vsel %vm1191_vm6, 1, %v1913_v32 }
 0x19d   : > { %1636 = vmatmul.mubr.bf16.gmra.mxu1 %v1019_v38 }
 0x19e   : > { %v995_v0 = vadd.f32 %v2246_v22, %v972_v42  ;;  %v1013_v13 = vmax.f32 %v997_v59, 0.0 }
 0x1a0   : > { %v1011_v44 = vmax.f32 %v995_v0, 0.0  ;;  %v1021_v46 = vpack.c.bf16 %v1013_v13, %v1012_v8 }
 0x1a2   : > { %v1020_v45 = vpack.c.bf16 %v1011_v44, %v1010_v43  ;;  %v2334_v43 = vrot.slane %v1288_v36, %v1291_v3 }
 0x1a4   : > { %1639 = vmatprep.mubr.bf16.mxu1 %v1020_v45  ;;  %vm1293_vm7 = vcmp.eq.s32.totalorder %v2334_v43, 1 }
 0x1a5   : > { %1640 = vmatmul.mubr.bf16.gmra.mxu1 %v1021_v46 }
 0x24d   : > { %v1629_v47 = vpop.f32.mrf.mxu1 }
 0x24e   : > { %v2275_v48 = vadd.f32 %v1629_v47, %v2272_v39 }
 0x24f   : > { %v1127_v49 = vpop.f32.mrf.mxu1 }
 0x250   : > { %v1493_v22 = vmul.f32 -1.442695, %v2275_v48  ;;  %v2279_v50 = vadd.f32 %v2272_v39, %v1127_v49 }
 0x251   : > { %v1630_v51 = vpop.f32.mrf.mxu1 }
 0x252   : > { %1753 = vpow2.f32 %v1493_v22  ;;  %v1491_v52 = vmul.f32 -1.442695, %v2279_v50  ;;  %v2283_v53 = vadd.f32 %v1630_v51, %v2272_v39 }
 0x253   : > { %v1130_v54 = vpop.f32.mrf.mxu1 }
 0x254   : > { %1755 = vpow2.f32 %v1491_v52  ;;  %v1494_v55 = vmul.f32 -1.442695, %v2283_v53  ;;  %v2287_v56 = vadd.f32 %v2272_v39, %v1130_v54 }
 0x255   : > { %v1633_v57 = vpop.f32.mrf.mxu1 }
 0x256   : > { %1757 = vpow2.f32 %v1494_v55  ;;  %v1492_v58 = vmul.f32 -1.442695, %v2287_v56  ;;  %v2291_v60 = vadd.f32 %v1633_v57, %v2272_v39 }
 0x257   : > { %v1143_v7 = vpop.f32.mrf.mxu1 }
 0x258   : > { %1759 = vpow2.f32 %v1492_v58  ;;  %v1497_v9 = vmul.f32 -1.442695, %v2291_v60  ;;  %v2295_v10 = vadd.f32 %v2272_v39, %v1143_v7 }
 0x259   : > { %v1634_v11 = vpop.f32.mrf.mxu1 }
 0x25a   : > { %1761 = vpow2.f32 %v1497_v9  ;;  %v1495_v12 = vmul.f32 -1.442695, %v2295_v10  ;;  %v2299_v14 = vadd.f32 %v1634_v11, %v2272_v39 }
 0x25b   : > { %v1146_v15 = vpop.f32.mrf.mxu1 }
 0x25c   : > { %1763 = vpow2.f32 %v1495_v12  ;;  %v1498_v16 = vmul.f32 -1.442695, %v2299_v14  ;;  %v2303_v17 = vadd.f32 %v2272_v39, %v1146_v15 }
 0x25d   : > { %v1637_v62 = vpop.f32.mrf.mxu1 }
 0x25e   : > { %1765 = vpow2.f32 %v1498_v16  ;;  %v1496_v20 = vmul.f32 -1.442695, %v2303_v17  ;;  %v2310_v21 = vadd.f32 %v1637_v62, %v2272_v39 }
 0x25f   : > { %v1754_v2 = vpop.eup %1753  ;;  %v1159_v63 = vpop.f32.mrf.mxu1 }
 0x260   : > { %v1242_v23 = vadd.f32 1.0, %v1754_v2  ;;  %1767 = vpow2.f32 %v1496_v20  ;;  %v1501_v24 = vmul.f32 -1.442695, %v2310_v21  ;;  %v2314_v4 = vadd.f32 %v2272_v39, %v1159_v63 }
 0x261   : > { %v1756_v25 = vpop.eup %1755  ;;  %v1638_v26 = vpop.f32.mrf.mxu1 }
 0x262   : > { %1769 = vrcp.f32 %v1242_v23  ;;  %v1240_v28 = vadd.f32 1.0, %v1756_v25  ;;  %v1499_v19 = vmul.f32 -1.442695, %v2314_v4  ;;  %v2318_v29 = vadd.f32 %v1638_v26, %v2272_v39 }
 0x263   : > { %v1758_v27 = vpop.eup %1757  ;;  %1771 = vpow2.f32 %v1501_v24  ;;  %v1162_v30 = vpop.f32.mrf.mxu1 }
 0x264   : > { %1773 = vrcp.f32 %v1240_v28  ;;  %v1243_v31 = vadd.f32 1.0, %v1758_v27  ;;  %v1502_v33 = vmul.f32 -1.442695, %v2318_v29  ;;  %v2322_v34 = vadd.f32 %v2272_v39, %v1162_v30 }
 0x265   : > { %v1760_v35 = vpop.eup %1759  ;;  %1775 = vpow2.f32 %v1499_v19  ;;  %v1641_v41 = vpop.f32.mrf.mxu1 }
 0x266   : > { %1777 = vrcp.f32 %v1243_v31  ;;  %v1241_v5 = vadd.f32 1.0, %v1760_v35  ;;  %v1500_v37 = vmul.f32 -1.442695, %v2322_v34  ;;  %v2327_v38 = vadd.f32 %v1641_v41, %v2272_v39 }
 0x267   : > { %v1762_v40 = vpop.eup %1761  ;;  %1779 = vpow2.f32 %v1502_v33  ;;  %v1175_v59 = vpop.f32.mrf.mxu1 }
 0x268   : > { %1781 = vrcp.f32 %v1241_v5  ;;  %v1246_v42 = vadd.f32 1.0, %v1762_v40  ;;  %v1505_v6 = vmul.f32 -1.442695, %v2327_v38  ;;  %v2332_v0 = vadd.f32 %v2272_v39, %v1175_v59 }
 0x269   : > { %v1764_v13 = vpop.eup %1763  ;;  %1783 = vpow2.f32 %v1500_v37  ;;  %v1642_v44 = vpop.f32.mrf.mxu1 }
 0x26a   : > { %1785 = vrcp.f32 %v1246_v42  ;;  %v1244_v8 = vadd.f32 1.0, %v1764_v13  ;;  %v1503_v45 = vmul.f32 -1.442695, %v2332_v0  ;;  %v2338_v46 = vadd.f32 %v1642_v44, %v2272_v39 }
 0x26b   : > { %v1766_v47 = vpop.eup %1765  ;;  %1787 = vpow2.f32 %v1505_v6  ;;  %v1178_v49 = vpop.f32.mrf.mxu1 }
 0x26c   : > { %1789 = vrcp.f32 %v1244_v8  ;;  %v1247_v22 = vadd.f32 1.0, %v1766_v47  ;;  %v1506_v51 = vmul.f32 -1.442695, %v2338_v46  ;;  %v2344_v52 = vadd.f32 %v2272_v39, %v1178_v49 }
 0x26d   : > { %v1768_v54 = vpop.eup %1767  ;;  %1791 = vpow2.f32 %v1503_v45 }
 0x26e   : > { %1793 = vrcp.f32 %v1247_v22  ;;  %v1245_v55 = vadd.f32 1.0, %v1768_v54  ;;  %v1504_v57 = vmul.f32 -1.442695, %v2344_v52 }
 0x26f   : > { %v1770_v58 = vpop.eup %1769  ;;  %1795 = vpow2.f32 %v1506_v51 }
 0x270   : > { %v1772_v7 = vpop.eup %1771  ;;  %v1296_v9 = vsel %vm1293_vm7, %v1770_v58, %v2275_v48  ;;  %1797 = vrcp.f32 %v1245_v55 }
 0x271   : > { %v1774_v11 = vpop.eup %1773  ;;  %1312 = vst [vmem:[%s2351_s12 + $0x10] sm:$0xff] %v1296_v9  ;;  %v1250_v39 = vadd.f32 1.0, %v1772_v7  ;;  %1799 = vpow2.f32 %v1504_v57 }
 0x272   : > { %v1776_v12 = vpop.eup %1775  ;;  %v1294_v15 = vsel %vm1293_vm7, %v1774_v11, %v2279_v50 }
 0x273   : > { %v1778_v16 = vpop.eup %1777  ;;  %1310 = vst [vmem:[%s2351_s12] sm:$0xff] %v1294_v15  ;;  %1801 = vrcp.f32 %v1250_v39  ;;  %v1248_v48 = vadd.f32 1.0, %v1776_v12 }
 0x274   : > { %v1780_v61 = vpop.eup %1779  ;;  %v1297_v62 = vsel %vm1293_vm7, %v1778_v16, %v2283_v53 }
 0x275   : > { %v1782_v18 = vpop.eup %1781  ;;  %1313 = vst [vmem:[%s2351_s12 + $0x18] sm:$0xff] %v1297_v62  ;;  %1803 = vrcp.f32 %v1248_v48  ;;  %v1251_v20 = vadd.f32 1.0, %v1780_v61 }
 0x276   : > { %v1784_v2 = vpop.eup %1783  ;;  %v1295_v50 = vsel %vm1293_vm7, %v1782_v18, %v2287_v56 }
 0x277   : > { %v1786_v63 = vpop.eup %1785  ;;  %1311 = vst [vmem:[%s2351_s12 + $0x8] sm:$0xff] %v1295_v50  ;;  %1805 = vrcp.f32 %v1251_v20  ;;  %v1249_v23 = vadd.f32 1.0, %v1784_v2 }
 0x278   : > { %v1788_v24 = vpop.eup %1787  ;;  %v1300_v53 = vsel %vm1293_vm7, %v1786_v63, %v2291_v60 }
 0x279   : > { %v1790_v25 = vpop.eup %1789  ;;  %1316 = vst [vmem:[%s2351_s12 + $0x30] sm:$0xff] %v1300_v53  ;;  %1807 = vrcp.f32 %v1249_v23  ;;  %v1254_v1 = vadd.f32 1.0, %v1788_v24 }
 0x27a   : > { %v1792_v26 = vpop.eup %1791  ;;  %v1298_v56 = vsel %vm1293_vm7, %v1790_v25, %v2295_v10 }
 0x27b   : > { %v1794_v28 = vpop.eup %1793  ;;  %1314 = vst [vmem:[%s2351_s12 + $0x20] sm:$0xff] %v1298_v56  ;;  %1809 = vrcp.f32 %v1254_v1  ;;  %v1252_v19 = vadd.f32 1.0, %v1792_v26 }
 0x27c   : > { %v1796_v27 = vpop.eup %1795  ;;  %v1301_v60 = vsel %vm1293_vm7, %v1794_v28, %v2299_v14 }
 0x27d   : > { %v1798_v30 = vpop.eup %1797  ;;  %1317 = vst [vmem:[%s2351_s12 + $0x38] sm:$0xff] %v1301_v60  ;;  %1811 = vrcp.f32 %v1252_v19  ;;  %v1255_v31 = vadd.f32 1.0, %v1796_v27 }
 0x27e   : > { %v1800_v33 = vpop.eup %1799  ;;  %v1299_v10 = vsel %vm1293_vm7, %v1798_v30, %v2303_v17 }
 0x27f   : > { %1315 = vst [vmem:[%s2351_s12 + $0x28] sm:$0xff] %v1299_v10  ;;  %1813 = vrcp.f32 %v1255_v31  ;;  %v1253_v35 = vadd.f32 1.0, %v1800_v33 }
 0x280   : > { %v1802_v32 = vpop.eup %1801 }
 0x281   : > { %v1304_v14 = vsel %vm1293_vm7, %v1802_v32, %v2310_v21  ;;  %1815 = vrcp.f32 %v1253_v35 }
 0x282   : > { %v1804_v36 = vpop.eup %1803  ;;  %1320 = vst [vmem:[%s2351_s12 + $0x50] sm:$0xff] %v1304_v14 }
 0x283   : > { %v1302_v3 = vsel %vm1293_vm7, %v1804_v36, %v2314_v4 }
 0x284   : > { %v1806_v41 = vpop.eup %1805  ;;  %1318 = vst [vmem:[%s2351_s12 + $0x40] sm:$0xff] %v1302_v3 }
 0x285   : > { %v1305_v17 = vsel %vm1293_vm7, %v1806_v41, %v2318_v29 }
 0x286   : > { %v1808_v5 = vpop.eup %1807  ;;  %1321 = vst [vmem:[%s2351_s12 + $0x58] sm:$0xff] %v1305_v17 }
 0x287   : > { %v1303_v21 = vsel %vm1293_vm7, %v1808_v5, %v2322_v34 }
 0x288   : > { %v1810_v37 = vpop.eup %1809  ;;  %1319 = vst [vmem:[%s2351_s12 + $0x48] sm:$0xff] %v1303_v21 }
 0x289   : > { %v1308_v4 = vsel %vm1293_vm7, %v1810_v37, %v2327_v38 }
 0x28a   : > { %v1812_v40 = vpop.eup %1811  ;;  %1324 = vst [vmem:[%s2351_s12 + $0x70] sm:$0xff] %v1308_v4 }
 0x28b   : > { %v1306_v29 = vsel %vm1293_vm7, %v1812_v40, %v2332_v0 }
 0x28c   : > { %v1814_v59 = vpop.eup %1813  ;;  %1322 = vst [vmem:[%s2351_s12 + $0x60] sm:$0xff] %v1306_v29 }
 0x28d   : > { %v1309_v34 = vsel %vm1293_vm7, %v1814_v59, %v2338_v46 }
 0x28e   : > { %v1816_v38 = vpop.eup %1815  ;;  %1325 = vst [vmem:[%s2351_s12 + $0x78] sm:$0xff] %v1309_v34 }
 0x28f   : > { %v1307_v42 = vsel %vm1293_vm7, %v1816_v38, %v2344_v52 }
 0x290   : > { %1323 = vst [vmem:[%s2351_s12 + $0x68] sm:$0xff] %v1307_v42 }
 0x291   : > { %1830 = shalt.err (!%p1827_p6)
}
 0x292   : > { %s1831_s30 = scalar_lea.hbm %s2415_s20, 2048  ;;  %s1835_s18 = scalar_lea.hbm %s2484_s6, 8192 }
 0x293   : > { %p1832_p7 = scmp.ne.s32.totalorder %s2415_s20, %s1831_s30  ;;  %p1836_p11 = scmp.lt.s32.totalorder %s2415_s20, %s2484_s6 }
 0x294   : > { %p1837_p12 = scmp.lt.s32.totalorder %s1835_s18, %s1831_s30 }
 0x295   : > { %p1833_p9 = pnand %p1832_p7, %p2002_p3 }
 0x296   : > { %p1838_p13 = por %p1837_p12, %p1836_p11 }
 0x297   : > { %p1834_p10 = pneg %p1833_p9 }
 0x299   : > { %p1839_p0 = pnand %p1838_p13, %p1834_p10 }
 0x29b   : > { %1842 = shalt.err (!%p1839_p0)
}
 0x29c   : > { %s1915_s9 = smov 128  }
 0x29d   : > { %1647 = dma.vmem_to_hbm [thread:$0]  (%p2002_p3), %s2418_s25, 2048, %s2415_s20, %s2426_s29, %s1915_s9, %s1915_s9, %s1911_s13  }
 0x29e PF: > { %p1653_p1 = scmp.ge.s32.totalorder %s1909_s28, 2  ;;  %s1357_s16 = sand.u32 1, %s1881_s21  }
 0x29f   : > { %s1358_s17 = scalar_lea.sflag [#allocation3], %s1357_s16 }
 0x2a0   : > { %p1650_p2 = pnand %p1653_p1, %p2011_p8 }
 0x2a2   : > { %p1651_p4 = pneg %p1650_p2 }
 0x2a4   : > { %1876 = dma.done.wait (%p1651_p4), %s1358_s17, 2048  }
 0x2a5   : > { %1878 = vsyncadd (%p1651_p4), %s1358_s17, 4294965248  ;;  %s19_s28 = sadd.s32 1, %s1909_s28   ;;  %s2487_s21 = smov %s1885_s22 }
 0x2a6   : > { %p16_p5 = scmp.ge.s32.totalorder %s19_s28, 6   ;;  %s2488_s22 = smov %s1889_s23 }
 0x2a7   : > { %s2489_s23 = smov %s2020_s15  ;;  %s2490_s24 = smov %s1901_s26 }
 0x2a8   : > { %s2491_s25 = smov %s1905_s27  ;;  %s2492_s26 = smov %s2495_s7 }
 0x2a9   : > { %s2493_s27 = smov %s2499_s8  ;;  %18 = sbr.rel (!%p16_p5) target bundleno = 5 (0x5), region = 82 }
 0x2ae   :  { %1363 = vsyncpa [#allocation3], 1 }
 0x2af   :  { %1365 = vsyncpa [#allocation3 + $0x1], 1 }

// kernel: tpu_custom_call.1
= control target key start
LH: loop header
LB: loop body
LE: loop exit
PB: predicated region body
PF: predicated region fallthrough
CT: control target
= control target key end

     0   :  { %11 = vsyncpa [#allocation3], 0  ;;  %s2478_s0 = inlined_call_operand.vmem [shape: bf16[2,18,18,4], index: 0, kind: input, shape index: {}]   ;;  %s2479_s1 = inlined_call_operand.vmem [shape: bf16[3,12,128], index: 1, kind: input, shape index: {}]   ;;  %s2480_s2 = inlined_call_operand.vmem [shape: f32[1,128], index: 2, kind: input, shape index: {}]   ;;  %s2481_s3 = inlined_call_operand.vmem [shape: bf16[128,128], index: 3, kind: input, shape index: {}]   ;;  %s2482_s4 = inlined_call_operand.vmem [shape: f32[1,128], index: 4, kind: input, shape index: {}]   ;;  %s2483_s5 = inlined_call_operand.vmem [shape: f32[1,128], index: 5, kind: input, shape index: {}]   ;;  %s2484_s6 = inlined_call_operand.hbm [shape: f32[2,256,128], index: 6, kind: output, shape index: {}]  }
   0x1   :  { %13 = vsyncpa [#allocation3 + $0x1], 0  ;;  %s1951_s21 = smov 0   ;;  %s1953_s22 = smov 0  }
   0x2   :  { %s1955_s23 = smov 0   ;;  %s1957_s24 = smov 0  }
   0x3   :  { %s1959_s25 = smov 0   ;;  %s1961_s26 = smov 0  }
   0x4   :  { %s1963_s27 = smov 0   ;;  %s1965_s28 = smov 0  }
   0x5 LB: > { %s1420_s29 = sadd.s32 4294967295, %s1909_s28   ;;  %s1421_s30 = sadd.s32 4294967294, %s1909_s28   ;;  %s1909_s28 = sphi %s1965_s28, %s19_s28   ;;  %s1905_s27 = sphi %s1963_s27, %s2493_s27   ;;  %s1901_s26 = sphi %s1961_s26, %s2492_s26   ;;  %s1897_s25 = sphi %s1959_s25, %s2491_s25   ;;  %s1893_s24 = sphi %s1957_s24, %s2490_s24   ;;  %s1889_s23 = sphi %s1955_s23, %s2489_s23   ;;  %s1885_s22 = sphi %s1953_s22, %s2488_s22   ;;  %s1881_s21 = sphi %s1951_s21, %s2487_s21  }
   0x6   : > { %s28_s7 = sadd.s32 1, %s1901_s26  ;;  %s31_s8 = sadd.s32 1, %s1905_s27 }
   0x7   : > { %p29_p0 = scmp.ge.s32.totalorder %s28_s7, 2  ;;  %p181_p1 = scmp.ne.s32.totalorder %s1889_s23, %s1885_s22 }
   0x8   : > { %p182_p2 = scmp.eq.s32.totalorder %s1420_s29, 3  ;;  %p187_p5 = scmp.ne.s32.totalorder %s1885_s22, %s1881_s21 }
   0x9   : > { %s2495_s7 = smov (%p29_p0, %s28_s7), 0  ;;  %s2497_s8 = smov (!%p29_p0, %s31_s8), %s1905_s27 }
   0xa   : > { %s167_s9 = ssub.s32 %s1901_s26, %s2495_s7  ;;  %p2002_p3 = por %p182_p2, %p181_p1 }
   0xb   : > { %p33_p4 = scmp.ge.s32.totalorder %s2497_s8, 2  ;;  %p188_p6 = scmp.eq.s32.totalorder %s1421_s30, 3 }
   0xc   : > { %p1424_p7 = scmp.ge.s32.totalorder %s1909_s28, 1  ;;  %p229_p9 = scmp.lt.s32.totalorder %s1909_s28, 5 }
   0xd   : > { %s2499_s8 = smov (%p33_p4, %s2497_s8), 0  ;;  %p2011_p8 = por %p188_p6, %p187_p5 }
   0xe   : > { %s166_s12 = ssub.s32 %s1905_s27, %s2499_s8  ;;  %s171_s13 = sadd.s32 1, %s1889_s23 }
   0xf   : > { %s168_s14 = sor.u32 %s167_s9, %s166_s12  ;;  %p230_p10 = pnand %p1424_p7, %p229_p9 }
  0x10   : > { %p169_p11 = scmp.eq.s32.totalorder %s168_s14, 0  ;;  %p259_p12 = scmp.lt.s32.totalorder (!%p230_p10), %s1897_s25, 1 }
  0x11   : > { %233 = sbr.rel (%p230_p10) target bundleno = 670 (0x29e), region = 44  ;;  %s1912_s14 = smov (!%p230_p10), 4  }
  0x12   : > { %s2020_s15 = scalar_select %p169_p11, %s1889_s23, %s171_s13  }
  0x13   : > { %s1513_s16 = smul.u32 (!%p230_p10), 96, %s1893_s24  ;;  %s1911_s13 = smov (!%p230_p10), 8  }
  0x14   : > { %s256_s30 = sand.u32 (!%p230_p10), 1, %s1885_s22  }
  0x15   : > { %s2426_s29 = scalar_lea.sflag (!%p230_p10), [#allocation3], %s256_s30 }
  0x16   : > { %s260_s17 = scalar_select %p259_p12, %s1897_s25, 1  ;;  %vm521_vm0 = vcmask 1046528   ;;  %v1742_v0 = vld [vmem:[%s2479_s1 + $0x8] sm:$0x3f]   ;;  %vm641_vm1 = vcmask 1045504   ;;  %vm572_vm3 = vcmask 31744  }
  0x17   : > { %vm380_vm2 = vsmask.f32 7424  ;;  %1643 = vmatprep.subr.msk.bf16.mxu0 %vm641_vm1, %v1742_v0  ;;  %v643_v1 = vsel %vm641_vm1, %v1742_v0, 0  ;;  %vm593_vm4 = vcmask 64512   ;;  %vm624_vm5 = vcmask 97280  }
  0x18   : > { %s1646_s18 = smul.u32 216, %s260_s17  ;;  %1558 = vmatpush3.bf16.msra.mxu0 %v643_v1 }
  0x1a   : > { %s263_s9 = scalar_lea.vmem %s2478_s0, %s1646_s18 }
  0x1b   : > { %s2031_s12 = scalar_lea.vmem %s263_s9, %s1513_s16  ;;  %s1425_s9 = sshll.u32 %s256_s30, 7 }
  0x1c   : > { %v2036_v2 = vld [vmem:[%s2031_s12 + $0xc] sm:$0xff]   ;;  %v1723_v3 = vld [vmem:[%s2031_s12 + $0x14] ss:$0 sps:$4 sm:$0x11]   ;;  %v2040_v4 = vld [vmem:[%s2031_s12 + $0x18] sm:$0xff]   ;;  %s1509_s16 = sshll.u32 %s1897_s25, 5 }
  0x1d   : > { %v525_v5 = vrot.slane %v2036_v2, 1  ;;  %v526_v6 = vrot.slane %v1723_v3, 1  ;;  %v394_v7 = vshrl.u32 %v2036_v2, 16  ;;  %v396_v8 = vshll.u32 %v2036_v2, 16  ;;  %v2052_v19 = vld [vmem:[%s2031_s12 + $0x30] sm:$0xff]   ;;  %v2059_v27 = vld [vmem:[%s2031_s12 + $0x24] sm:$0xff]  }
  0x1e   : > { %v401_v9 = vshll.u32 %v1723_v3, 16  ;;  %v1725_v10 = vld [vmem:[%s2031_s12 + $0x20] ss:$0 sps:$4 sm:$0x11]   ;;  %v528_v11 = vrot.slane %v2040_v4, 1  ;;  %v406_v12 = vshrl.u32 %v2040_v4, 16 }
  0x1f   : > { %v527_v13 = vsel %vm521_vm0, %v525_v5, %v526_v6  ;;  %v398_v14 = vrot.slane %v396_v8, 1  ;;  %v408_v15 = vshll.u32 %v2040_v4, 16  ;;  %v529_v17 = vrot.slane %v1725_v10, 1  ;;  %v1727_v22 = vld [vmem:[%s2031_s12 + $0x38] ss:$0 sps:$4 sm:$0x11]  }
  0x20   : > { %554 = vrot.lane.b32.xlu1 %v527_v13, %s1911_s13  ;;  %v403_v16 = vrot.slane %v401_v9, 1  ;;  %v413_v18 = vshll.u32 %v1725_v10, 16  ;;  %v430_v25 = vshrl.u32 %v2052_v19, 16  ;;  %v432_v26 = vshll.u32 %v2052_v19, 16  ;;  %v2064_v32 = vld [vmem:[%s2031_s12 + $0x48] sm:$0xff]   ;;  %v2073_v41 = vld [vmem:[%s2031_s12 + $0x3c] sm:$0xff]  }
  0x21   : > { %v399_v20 = vor.u32 %v398_v14, %v394_v7  ;;  %v410_v21 = vrot.slane %v408_v15, 1  ;;  %v530_v23 = vsel %vm521_vm0, %v528_v11, %v529_v17  ;;  %v437_v30 = vshll.u32 %v1727_v22, 16  ;;  %v1729_v31 = vld [vmem:[%s2031_s12 + $0x2c] ss:$0 sps:$4 sm:$0x11]   ;;  %v2088_v59 = vld [vmem:[%s2031_s12 + $0x60] sm:$0xff]  }
  0x22   : > { %v415_v24 = vrot.slane %v413_v18, 1  ;;  %v434_v33 = vrot.slane %v432_v26, 1  ;;  %v418_v34 = vshrl.u32 %v2059_v27, 16  ;;  %v420_v35 = vshll.u32 %v2059_v27, 16  ;;  %v2091_v0 = vld [vmem:[%s2031_s12 + $0x54] sm:$0xff]   ;;  %v2102_v13 = vld [vmem:[%s2031_s12] sm:$0xff]  }
  0x23   : > { %v404_v28 = vsel %vm380_vm2, %v399_v20, %v403_v16  ;;  %v411_v29 = vor.u32 %v410_v21, %v406_v12  ;;  %v534_v36 = vrot.slane %v2052_v19, 1  ;;  %v439_v38 = vrot.slane %v437_v30, 1  ;;  %v1731_v46 = vld [vmem:[%s2031_s12 + $0x50] ss:$0 sps:$4 sm:$0x11]  }
  0x24   : > { %503 = vrot.lane.b32.xlu0 %v404_v28, %s1912_s14  ;;  %556 = vrot.lane.b32.xlu1 %v530_v23, %s1911_s13  ;;  %v425_v39 = vshll.u32 %v1729_v31, 16  ;;  %v535_v40 = vrot.slane %v1727_v22, 1  ;;  %v435_v42 = vor.u32 %v434_v33, %v430_v25  ;;  %v422_v43 = vrot.slane %v420_v35, 1  ;;  %v1733_v55 = vld [vmem:[%s2031_s12 + $0x44] ss:$0 sps:$4 sm:$0x11]  }
  0x25   : > { %v416_v37 = vsel %vm380_vm2, %v411_v29, %v415_v24  ;;  %v531_v44 = vrot.slane %v2059_v27, 1  ;;  %v454_v47 = vshrl.u32 %v2064_v32, 16  ;;  %v456_v48 = vshll.u32 %v2064_v32, 16  ;;  %v1735_v3 = vld [vmem:[%s2031_s12 + $0x68] ss:$0 sps:$4 sm:$0x11]  }
  0x26   : > { %v427_v45 = vrot.slane %v425_v39, 1  ;;  %v440_v49 = vsel %vm380_vm2, %v435_v42, %v439_v38  ;;  %v423_v50 = vor.u32 %v422_v43, %v418_v34  ;;  %v532_v51 = vrot.slane %v1729_v31, 1  ;;  %v1737_v14 = vld [vmem:[%s2031_s12 + $0x5c] ss:$0 sps:$4 sm:$0x11]   ;;  %v2121_v39 = vld [vmem:[%s2031_s12 + $0x6c] sm:$0xff]  }
  0x27   : > { %v442_v52 = vshrl.u32 %v2073_v41, 16  ;;  %v458_v53 = vrot.slane %v456_v48, 1  ;;  %v461_v54 = vshll.u32 %v1731_v46, 16  ;;  %v444_v56 = vshll.u32 %v2073_v41, 16 }
  0x28   : > { %505 = vrot.lane.b32.xlu0 %v416_v37, %s1912_s14  ;;  %509 = vrot.lane.b32.xlu1 %v440_v49, %s1912_s14  ;;  %v428_v57 = vsel %vm380_vm2, %v423_v50, %v427_v45  ;;  %v536_v58 = vsel %vm521_vm0, %v534_v36, %v535_v40  ;;  %v449_v63 = vshll.u32 %v1733_v55, 16  ;;  %v540_v1 = vrot.slane %v2064_v32, 1  ;;  %v1739_v28 = vld [vmem:[%s2031_s12 + $0x8] ss:$0 sps:$4 sm:$0x11]  }
  0x29   : > { %v459_v60 = vor.u32 %v458_v53, %v454_v47  ;;  %v463_v61 = vrot.slane %v461_v54, 1  ;;  %v446_v62 = vrot.slane %v444_v56, 1  ;;  %v533_v5 = vsel %vm521_vm0, %v531_v44, %v532_v51  ;;  %v1743_v44 = vld [vmem:[%s2479_s1 + $0x10] sm:$0x3f]   ;;  %v1744_v45 = vld [vmem:[%s2479_s1] sm:$0x3f]  }
  0x2a   : > { %v451_v7 = vrot.slane %v449_v63, 1  ;;  %v541_v8 = vrot.slane %v1731_v46, 1  ;;  %v478_v10 = vshrl.u32 %v2088_v59, 16  ;;  %v480_v11 = vshll.u32 %v2088_v59, 16  ;;  %1645 = vmatprep.subr.msk.bf16.mxu0 %vm641_vm1, %v1743_v44  ;;  %1644 = vmatprep.subr.msk.bf16.mxu1 %vm641_vm1, %v1744_v45 }
  0x2b   : > { %v447_v6 = vor.u32 %v446_v62, %v442_v52  ;;  %v464_v9 = vsel %vm380_vm2, %v459_v60, %v463_v61  ;;  %v485_v12 = vshll.u32 %v1735_v3, 16  ;;  %v468_v15 = vshll.u32 %v2091_v0, 16  ;;  %v1741_v47 = vld [vmem:[%s2031_s12 + $0x74] ss:$0 sps:$4 sm:$0x11]   ;;  %s2351_s12 = scalar_lea.vmem [#allocation2], %s1425_s9 }
  0x2c   : > { %507 = vrot.lane.b32.xlu0 %v428_v57, %s1912_s14  ;;  %560 = vrot.lane.b32.xlu1 %v536_v58, %s1911_s13  ;;  %v537_v16 = vrot.slane %v2073_v41, 1  ;;  %v538_v17 = vrot.slane %v1733_v55, 1  ;;  %v482_v18 = vrot.slane %v480_v11, 1  ;;  %v466_v20 = vshrl.u32 %v2091_v0, 16  ;;  %s1342_s25 = sshll.u32 %s2351_s12, 4  ;;  %s2418_s25 = int_to_ptr.vmem [resolvable:$true] %s1342_s25 }
  0x2d   : > { %v452_v21 = vsel %vm380_vm2, %v447_v6, %v451_v7  ;;  %v487_v22 = vrot.slane %v485_v12, 1  ;;  %v470_v23 = vrot.slane %v468_v15, 1  ;;  %v473_v24 = vshll.u32 %v1737_v14, 16  ;;  %s1817_s9 = scalar_lea.vmem %s2418_s25, 2048 }
  0x2e   : > { %v542_v25 = vsel %vm521_vm0, %v540_v1, %v541_v8  ;;  %v483_v26 = vor.u32 %v482_v18, %v478_v10  ;;  %v384_v29 = vshll.u32 %v2102_v13, 16  ;;  %v539_v30 = vsel %vm521_vm0, %v537_v16, %v538_v17  ;;  %p1818_p13 = scmp.ne.s32.totalorder %s2418_s25, %s1817_s9 }
  0x2f   : > { %v546_v31 = vrot.slane %v2088_v59, 1  ;;  %v547_v33 = vrot.slane %v1735_v3, 1  ;;  %v543_v34 = vrot.slane %v2091_v0, 1  ;;  %v471_v35 = vor.u32 %v470_v23, %v466_v20 }
  0x30   : > { %558 = vrot.lane.b32.xlu0 %v533_v5, %s1911_s13  ;;  %513 = vrot.lane.b32.xlu1 %v464_v9, %s1912_s14  ;;  %v475_v36 = vrot.slane %v473_v24, 1  ;;  %v544_v37 = vrot.slane %v1737_v14, 1  ;;  %v382_v38 = vshrl.u32 %v2102_v13, 16  ;;  %v488_v40 = vsel %vm380_vm2, %v483_v26, %v487_v22  ;;  %p1819_p0 = pnand %p1818_p13, %p2002_p3 }
  0x31   : > { %v386_v42 = vrot.slane %v384_v29, 1  ;;  %v522_v43 = vrot.slane %v2102_v13, 1  ;;  %v389_v46 = vshll.u32 %v1739_v28, 16  ;;  %v860_v48 = vsel %vm641_vm1, %v1743_v44, 0 }
  0x32   : > { %v750_v49 = vsel %vm641_vm1, %v1744_v45, 0  ;;  %v476_v50 = vsel %vm380_vm2, %v471_v35, %v475_v36  ;;  %v523_v51 = vrot.slane %v1739_v28, 1  ;;  %v492_v52 = vshll.u32 %v2121_v39, 16  ;;  %v1745_v45 = vld [vmem:[%s2481_s3 + $0x38] sm:$0xff]   ;;  %p1820_p1 = pneg %p1819_p0 }
  0x33   : > { %v548_v53 = vsel %vm521_vm0, %v546_v31, %v547_v33  ;;  %1576 = vmatpush3.bf16.msra.mxu1 %v750_v49  ;;  %v545_v54 = vsel %vm521_vm0, %v543_v34, %v544_v37  ;;  %v490_v55 = vshrl.u32 %v2121_v39, 16  ;;  %v387_v56 = vor.u32 %v386_v42, %v382_v38  ;;  %v1750_v49 = vld [vmem:[%s2481_s3 + $0x10] sm:$0xff]  }
  0x34   : > { %511 = vrot.lane.b32.xlu0 %v452_v21, %s1912_s14  ;;  %564 = vrot.lane.b32.xlu1 %v542_v25, %s1911_s13  ;;  %v391_v57 = vrot.slane %v389_v46, 1  ;;  %v494_v58 = vrot.slane %v492_v52, 1  ;;  %v497_v60 = vshll.u32 %v1741_v47, 16  ;;  %v524_v61 = vsel %vm521_vm0, %v522_v43, %v523_v51  ;;  %v1746_v46 = vld [vmem:[%s2481_s3 + $0x30] sm:$0xff]   ;;  %v1752_v51 = vld [vmem:[%s2481_s3] sm:$0xff]  }
  0x35   : > { %v549_v62 = vrot.slane %v2121_v39, 1  ;;  %v550_v63 = vrot.slane %v1741_v47, 1  ;;  %1611 = vmatprep.subr.bf16.mxu1 %v1745_v45  ;;  %v1748_v47 = vld [vmem:[%s2481_s3 + $0x20] sm:$0xff]  }
  0x36   : > { %v392_v1 = vsel %vm380_vm2, %v387_v56, %v391_v57  ;;  %v495_v3 = vor.u32 %v494_v58, %v490_v55  ;;  %v499_v5 = vrot.slane %v497_v60, 1 }
  0x37   : > { %v551_v6 = vsel %vm521_vm0, %v549_v62, %v550_v63 }
  0x38   : > { %562 = vrot.lane.b32.xlu0 %v539_v30, %s1911_s13  ;;  %517 = vrot.lane.b32.xlu1 %v488_v40, %s1912_s14  ;;  %v500_v7 = vsel %vm380_vm2, %v495_v3, %v499_v5 }
  0x3c   : > { %515 = vrot.lane.b32.xlu0 %v476_v50, %s1912_s14  ;;  %568 = vrot.lane.b32.xlu1 %v548_v53, %s1911_s13  ;;  %v1751_v50 = vld [vmem:[%s2481_s3 + $0x8] sm:$0xff]  }
  0x40   : > { %566 = vrot.lane.b32.xlu0 %v545_v54, %s1911_s13  ;;  %552 = vrot.lane.b32.xlu1 %v524_v61, %s1911_s13 }
  0x44   : > { %501 = vrot.lane.b32.xlu0 %v392_v1, %s1912_s14  ;;  %570 = vrot.lane.b32.xlu1 %v551_v6, %s1911_s13 }
  0x48   : > { %519 = vrot.lane.b32.xlu0 %v500_v7, %s1912_s14  ;;  %s1508_s14 = sshll.u32 %s1893_s24, 4 }
  0x49   : > { %s1339_s17 = sadd.s32 %s1509_s16, %s1508_s14  ;;  %s1914_s14 = smov [#allocation2]  }
  0x4a   : > { %s1510_s24 = sshll.u32 %s1339_s17, 7  ;;  %s1821_s16 = sshll.u32 %s1914_s14, 4  ;;  %s1822_s16 = int_to_ptr.vmem [resolvable:$false] %s1821_s16 }
  0x4b   : > { %s2415_s20 = scalar_lea.hbm %s2484_s6, %s1510_s24  ;;  %s1823_s17 = scalar_lea.vmem %s1822_s16, 4096 }
  0x4c   : > { %p1824_p2 = scmp.lt.s32.totalorder %s2418_s25, %s1822_s16  ;;  %p1825_p4 = scmp.lt.s32.totalorder %s1823_s17, %s1817_s9 }
  0x4e   : > { %p1826_p5 = por %p1825_p4, %p1824_p2 }
  0x50   : > { %p1827_p6 = pnand %p1826_p5, %p1820_p1 }
  0x92   : > { %v555_v8 = vpop.permute.xlu1 %554 }
  0x96   : > { %v504_v9 = vpop.permute.xlu0 %503  ;;  %v557_v10 = vpop.permute.xlu1 %556 }
  0x97   : > { %v576_v11 = vsel %vm572_vm3, %v2036_v2, %v504_v9 }
  0x98   : > { %v597_v12 = vsel %vm593_vm4, %v576_v11, %v555_v8 }
  0x99   : > { %1559 = vmatprep.mubr.msk.bf16.mxu0 %vm624_vm5, %v597_v12 }
  0x9a   : > { %v506_v14 = vpop.permute.xlu0 %505  ;;  %v510_v16 = vpop.permute.xlu1 %509 }
  0x9b   : > { %v578_v15 = vsel %vm572_vm3, %v2040_v4, %v506_v14  ;;  %v582_v21 = vsel %vm572_vm3, %v2052_v19, %v510_v16 }
  0x9c   : > { %v599_v17 = vsel %vm593_vm4, %v578_v15, %v557_v10 }
  0x9d   : > { %1560 = vmatmul.mubr.msk.bf16.vlgmr.msra.gmra.mxu0 %vm624_vm5, %v599_v17 }
  0x9e   : > { %1594 = vmatpush3.bf16.msra.mxu0 %v860_v48  ;;  %v508_v18 = vpop.permute.xlu0 %507  ;;  %v561_v20 = vpop.permute.xlu1 %560  ;;  %v1749_v48 = vld [vmem:[%s2481_s3 + $0x18] sm:$0xff]  }
  0x9f   : > { %v580_v2 = vsel %vm572_vm3, %v2059_v27, %v508_v18  ;;  %v603_v4 = vsel %vm593_vm4, %v582_v21, %v561_v20 }
  0xa2   : > { %v559_v22 = vpop.permute.xlu0 %558  ;;  %v514_v24 = vpop.permute.xlu1 %513 }
  0xa3   : > { %v601_v23 = vsel %vm593_vm4, %v580_v2, %v559_v22  ;;  %v586_v28 = vsel %vm572_vm3, %v2064_v32, %v514_v24  ;;  %v2246_v22 = vld [vmem:[%s2480_s2] ss:$0 sm:$0xff] }
  0xa4   : > { %1563 = vmatprep.mubr.msk.bf16.mxu0 %vm624_vm5, %v601_v23 }
  0xa5   : > { %1564 = vmatmul.mubr.msk.bf16.gmra.mxu0 %vm624_vm5, %v603_v4 }
  0xa6   : > { %v512_v25 = vpop.permute.xlu0 %511  ;;  %v565_v26 = vpop.permute.xlu1 %564 }
  0xa7   : > { %v584_v19 = vsel %vm572_vm3, %v2073_v41, %v512_v25  ;;  %v607_v31 = vsel %vm593_vm4, %v586_v28, %v565_v26 }
  0xaa   : > { %v563_v29 = vpop.permute.xlu0 %562  ;;  %v518_v30 = vpop.permute.xlu1 %517 }
  0xab   : > { %v605_v27 = vsel %vm593_vm4, %v584_v19, %v563_v29  ;;  %v590_v34 = vsel %vm572_vm3, %v2088_v59, %v518_v30 }
  0xac   : > { %1567 = vmatprep.mubr.msk.bf16.mxu0 %vm624_vm5, %v605_v27 }
  0xad   : > { %1568 = vmatmul.mubr.msk.bf16.gmra.mxu0 %vm624_vm5, %v607_v31 }
  0xae   : > { %v516_v33 = vpop.permute.xlu0 %515  ;;  %v569_v35 = vpop.permute.xlu1 %568 }
  0xaf   : > { %v588_v32 = vsel %vm572_vm3, %v2091_v0, %v516_v33  ;;  %v611_v37 = vsel %vm593_vm4, %v590_v34, %v569_v35 }
  0xb2   : > { %v567_v36 = vpop.permute.xlu0 %566  ;;  %v553_v38 = vpop.permute.xlu1 %552 }
  0xb3   : > { %v609_v41 = vsel %vm593_vm4, %v588_v32, %v567_v36 }
  0xb4   : > { %1571 = vmatprep.mubr.msk.bf16.mxu0 %vm624_vm5, %v609_v41 }
  0xb5   : > { %1572 = vmatmul.mubr.msk.bf16.gmra.mxu0 %vm624_vm5, %v611_v37 }
  0xb6   : > { %1595 = vmatprep.mubr.msk.bf16.mxu0 %vm624_vm5, %v599_v17  ;;  %v502_v40 = vpop.permute.xlu0 %501  ;;  %v571_v43 = vpop.permute.xlu1 %570 }
  0xb7   : > { %v574_v59 = vsel %vm572_vm3, %v2102_v13, %v502_v40 }
  0xb8   : > { %v595_v42 = vsel %vm593_vm4, %v574_v59, %v553_v38 }
  0xb9   : > { %1577 = vmatprep.mubr.msk.bf16.mxu1 %vm624_vm5, %v595_v42 }
  0xba   : > { %1578 = vmatmul.mubr.msk.bf16.vlgmr.msra.gmra.mxu1 %vm624_vm5, %v597_v12  ;;  %v520_v0 = vpop.permute.xlu0 %519 }
  0xbb   : > { %1581 = vmatprep.mubr.msk.bf16.mxu1 %vm624_vm5, %v599_v17  ;;  %v592_v13 = vsel %vm572_vm3, %v2121_v39, %v520_v0  ;;  %1612 = vmatpush3.bf16.msra.mxu1 %v1745_v45  ;;  %v1747_v39 = vld [vmem:[%s2481_s3 + $0x28] sm:$0xff]  }
  0xbc   : > { %v613_v44 = vsel %vm593_vm4, %v592_v13, %v571_v43  ;;  %1613 = vmatprep.subr.bf16.mxu1 %v1746_v46 }
  0xbd   : > { %1596 = vmatmul.mubr.msk.bf16.vlgmr.msra.gmra.mxu0 %vm624_vm5, %v601_v23 }
  0xbe   : > { %1599 = vmatprep.mubr.msk.bf16.mxu0 %vm624_vm5, %v603_v4 }
  0xbf   : > { %1614 = vmatpush3.bf16.msra.mxu1 %v1746_v46 }
  0xc0   : > { %1615 = vmatprep.subr.bf16.mxu1 %v1747_v39 }
  0xc2   : > { %1582 = vmatmul.mubr.msk.bf16.gmra.mxu1 %vm624_vm5, %v601_v23 }
  0xc3   : > { %1585 = vmatprep.mubr.msk.bf16.mxu1 %vm624_vm5, %v603_v4  ;;  %1616 = vmatpush3.bf16.msra.mxu1 %v1747_v39 }
  0xc4   : > { %1617 = vmatprep.subr.bf16.mxu1 %v1748_v47 }
  0xc5   : > { %1600 = vmatmul.mubr.msk.bf16.gmra.mxu0 %vm624_vm5, %v605_v27 }
  0xc6   : > { %1603 = vmatprep.mubr.msk.bf16.mxu0 %vm624_vm5, %v607_v31 }
  0xc7   : > { %1618 = vmatpush3.bf16.msra.mxu1 %v1748_v47 }
  0xc8   : > { %1619 = vmatprep.subr.bf16.mxu1 %v1749_v48 }
  0xca   : > { %1586 = vmatmul.mubr.msk.bf16.gmra.mxu1 %vm624_vm5, %v605_v27 }
  0xcb   : > { %1589 = vmatprep.mubr.msk.bf16.mxu1 %vm624_vm5, %v607_v31  ;;  %1620 = vmatpush3.bf16.msra.mxu1 %v1749_v48 }
  0xcc   : > { %1621 = vmatprep.subr.bf16.mxu1 %v1750_v49 }
  0xcd   : > { %1604 = vmatmul.mubr.msk.bf16.gmra.mxu0 %vm624_vm5, %v609_v41 }
  0xce   : > { %1607 = vmatprep.mubr.msk.bf16.mxu0 %vm624_vm5, %v611_v37 }
  0xcf   : > { %1622 = vmatpush3.bf16.msra.mxu1 %v1750_v49 }
  0xd0   : > { %1623 = vmatprep.subr.bf16.mxu1 %v1751_v50 }
  0xd2   : > { %1590 = vmatmul.mubr.msk.bf16.gmra.mxu1 %vm624_vm5, %v609_v41 }
  0xd3   : > { %1624 = vmatpush3.bf16.msra.mxu1 %v1751_v50 }
  0xd4   : > { %1625 = vmatprep.subr.bf16.mxu1 %v1752_v51 }
  0xd5   : > { %1608 = vmatmul.mubr.msk.bf16.gmra.mxu0 %vm624_vm5, %v613_v44 }
  0xd7   : > { %1626 = vmatpush3.bf16.msra.mxu1 %v1752_v51 }
 0x15d   : > { %v1561_v52 = vpop.f32.mrf.mxu0 }
 0x15f   : > { %v679_v53 = vpop.f32.mrf.mxu0 }
 0x161   : > { %v1562_v54 = vpop.f32.mrf.mxu0 }
 0x163   : > { %v682_v55 = vpop.f32.mrf.mxu0 }
 0x165   : > { %v1565_v56 = vpop.f32.mrf.mxu0 }
 0x167   : > { %v695_v57 = vpop.f32.mrf.mxu0 }
 0x169   : > { %v1566_v58 = vpop.f32.mrf.mxu0 }
 0x16b   : > { %v698_v60 = vpop.f32.mrf.mxu0 }
 0x16d   : > { %v1569_v61 = vpop.f32.mrf.mxu0 }
 0x16f   : > { %v711_v62 = vpop.f32.mrf.mxu0 }
 0x171   : > { %v1570_v63 = vpop.f32.mrf.mxu0 }
 0x173   : > { %v2233_v1 = vpop.f32.mrf.mxu0 }
 0x175   : > { %v2235_v3 = vpop.f32.mrf.mxu0 }
 0x177   : > { %v2237_v5 = vpop.f32.mrf.mxu0 }
 0x179   : > { %v2239_v6 = vpop.f32.mrf.mxu0 }
 0x17a   : > { %v1579_v7 = vpop.f32.mrf.mxu1 }
 0x17b   : > { %v2241_v8 = vpop.f32.mrf.mxu0  ;;  %v795_v10 = vadd.f32 %v1579_v7, %v1561_v52 }
 0x17c   : > { %v786_v9 = vpop.f32.mrf.mxu1 }
 0x17d   : > { %v787_v11 = vadd.f32 %v786_v9, %v679_v53  ;;  %v1597_v12 = vpop.f32.mrf.mxu0 }
 0x17e   : > { %v1580_v14 = vpop.f32.mrf.mxu1  ;;  %v961_v20 = vadd.f32 %v1597_v12, %v795_v10 }
 0x17f   : > { %v798_v15 = vadd.f32 %v1580_v14, %v1562_v54  ;;  %v896_v16 = vpop.f32.mrf.mxu0 }
 0x180   : > { %v959_v17 = vadd.f32 %v896_v16, %v787_v11  ;;  %v789_v18 = vpop.f32.mrf.mxu1  ;;  %v984_v29 = vadd.f32 %v2246_v22, %v961_v20 }
 0x181   : > { %v790_v21 = vadd.f32 %v789_v18, %v682_v55  ;;  %v1598_v2 = vpop.f32.mrf.mxu0 }
 0x182   : > { %v962_v23 = vadd.f32 %v1598_v2, %v798_v15  ;;  %v1583_v24 = vpop.f32.mrf.mxu1  ;;  %v982_v25 = vadd.f32 %v2246_v22, %v959_v17  ;;  %v1000_v59 = vmax.f32 %v984_v29, 0.0 }
 0x183   : > { %v899_v4 = vpop.f32.mrf.mxu0  ;;  %v811_v27 = vadd.f32 %v1583_v24, %v1565_v56 }
 0x184   : > { %v985_v26 = vadd.f32 %v2246_v22, %v962_v23  ;;  %v960_v28 = vadd.f32 %v899_v4, %v790_v21  ;;  %v802_v19 = vpop.f32.mrf.mxu1  ;;  %v998_v41 = vmax.f32 %v982_v25, 0.0 }
 0x185   : > { %v803_v30 = vadd.f32 %v802_v19, %v695_v57  ;;  %v1601_v31 = vpop.f32.mrf.mxu0 }
 0x186   : > { %v983_v33 = vadd.f32 %v2246_v22, %v960_v28  ;;  %v1584_v34 = vpop.f32.mrf.mxu1  ;;  %v1001_v35 = vmax.f32 %v985_v26, 0.0  ;;  %v965_v42 = vadd.f32 %v1601_v31, %v811_v27 }
 0x187   : > { %v814_v32 = vadd.f32 %v1584_v34, %v1566_v58  ;;  %v912_v36 = vpop.f32.mrf.mxu0 }
 0x188   : > { %v999_v37 = vmax.f32 %v983_v33, 0.0  ;;  %v963_v38 = vadd.f32 %v912_v36, %v803_v30  ;;  %v805_v40 = vpop.f32.mrf.mxu1  ;;  %v1015_v46 = vpack.c.bf16 %v1001_v35, %v1000_v59  ;;  %v988_v51 = vadd.f32 %v2246_v22, %v965_v42 }
 0x189   : > { %v806_v0 = vadd.f32 %v805_v40, %v698_v60  ;;  %v1602_v13 = vpop.f32.mrf.mxu0 }
 0x18a   : > { %v966_v43 = vadd.f32 %v1602_v13, %v814_v32  ;;  %v1587_v44 = vpop.f32.mrf.mxu1  ;;  %v1014_v45 = vpack.c.bf16 %v999_v37, %v998_v41  ;;  %v986_v47 = vadd.f32 %v2246_v22, %v963_v38  ;;  %v1004_v12 = vmax.f32 %v988_v51, 0.0 }
 0x18b   : > { %v915_v39 = vpop.f32.mrf.mxu0  ;;  %v827_v52 = vadd.f32 %v1587_v44, %v1569_v61 }
 0x18c   : > { %v989_v48 = vadd.f32 %v2246_v22, %v966_v43  ;;  %v964_v49 = vadd.f32 %v915_v39, %v806_v0  ;;  %v818_v50 = vpop.f32.mrf.mxu1  ;;  %1627 = vmatprep.mubr.bf16.mxu1 %v1014_v45  ;;  %v1002_v7 = vmax.f32 %v986_v47, 0.0  ;;  %v2272_v39 = vld [vmem:[%s2482_s4] ss:$0 sm:$0xff] }
 0x18d   : > { %v819_v53 = vadd.f32 %v818_v50, %v711_v62  ;;  %v1605_v54 = vpop.f32.mrf.mxu0  ;;  %1628 = vmatmul.mubr.bf16.vlgmr.msra.gmra.mxu1 %v1015_v46 }
 0x18e   : > { %v987_v55 = vadd.f32 %v2246_v22, %v964_v49  ;;  %v1588_v56 = vpop.f32.mrf.mxu1  ;;  %v1005_v57 = vmax.f32 %v989_v48, 0.0  ;;  %v969_v14 = vadd.f32 %v1605_v54, %v827_v52 }
 0x18f   : > { %v830_v58 = vadd.f32 %v1588_v56, %v1570_v63  ;;  %v928_v60 = vpop.f32.mrf.mxu0 }
 0x190   : > { %v1003_v9 = vmax.f32 %v987_v55, 0.0  ;;  %v967_v10 = vadd.f32 %v928_v60, %v819_v53  ;;  %v821_v11 = vpop.f32.mrf.mxu1  ;;  %v1017_v20 = vpack.c.bf16 %v1005_v57, %v1004_v12  ;;  %v992_v24 = vadd.f32 %v2246_v22, %v969_v14 }
 0x191   : > { %v822_v15 = vadd.f32 %v821_v11, %v2233_v1  ;;  %v1606_v16 = vpop.f32.mrf.mxu0 }
 0x192   : > { %v970_v17 = vadd.f32 %v1606_v16, %v830_v58  ;;  %v1591_v61 = vpop.f32.mrf.mxu1  ;;  %v1016_v62 = vpack.c.bf16 %v1003_v9, %v1002_v7  ;;  %v990_v21 = vadd.f32 %v2246_v22, %v967_v10  ;;  %v1008_v35 = vmax.f32 %v992_v24, 0.0 }
 0x193   : > { %v931_v18 = vpop.f32.mrf.mxu0  ;;  %v843_v4 = vadd.f32 %v1591_v61, %v2235_v3  ;;  %v1289_v61 = vlaneseq }
 0x194   : > { %v993_v2 = vadd.f32 %v2246_v22, %v970_v17  ;;  %v968_v63 = vadd.f32 %v931_v18, %v822_v15  ;;  %v834_v23 = vpop.f32.mrf.mxu1  ;;  %1631 = vmatprep.mubr.bf16.mxu1 %v1016_v62  ;;  %v1006_v30 = vmax.f32 %v990_v21, 0.0  ;;  %v1190_v18 = vld [vmem:[%s2483_s5] sm:$0x1] }
 0x195   : > { %v835_v25 = vadd.f32 %v834_v23, %v2237_v5  ;;  %v1609_v1 = vpop.f32.mrf.mxu0  ;;  %1632 = vmatmul.mubr.bf16.gmra.mxu1 %v1017_v20  ;;  %vm1191_vm6 = vcmp.gt.f32.partialorder %v1190_v18, 0.0 }
 0x196   : > { %v991_v26 = vadd.f32 %v2246_v22, %v968_v63  ;;  %v1592_v28 = vpop.f32.mrf.mxu1  ;;  %v1009_v19 = vmax.f32 %v993_v2, 0.0  ;;  %v973_v32 = vadd.f32 %v1609_v1, %v843_v4  ;;  %v1290_v1 = vshrl.u32 %v1289_v61, 7 }
 0x197   : > { %v846_v29 = vadd.f32 %v1592_v28, %v2239_v6  ;;  %v944_v27 = vpop.f32.mrf.mxu0 }
 0x198   : > { %v1007_v31 = vmax.f32 %v991_v26, 0.0  ;;  %v971_v33 = vadd.f32 %v944_v27, %v835_v25  ;;  %v837_v34 = vpop.f32.mrf.mxu1  ;;  %v1019_v38 = vpack.c.bf16 %v1009_v19, %v1008_v35  ;;  %v996_v6 = vadd.f32 %v2246_v22, %v973_v32 }
 0x199   : > { %v838_v36 = vadd.f32 %v837_v34, %v2241_v8  ;;  %v1610_v3 = vpop.f32.mrf.mxu0  ;;  %v1913_v32 = vmov 0  }
 0x19a   : > { %v974_v41 = vadd.f32 %v1610_v3, %v846_v29  ;;  %v1018_v5 = vpack.c.bf16 %v1007_v31, %v1006_v30  ;;  %v994_v40 = vadd.f32 %v2246_v22, %v971_v33  ;;  %v1012_v8 = vmax.f32 %v996_v6, 0.0 }
 0x19b   : > { %v947_v37 = vpop.f32.mrf.mxu0  ;;  %v1291_v3 = vsub.s32 0, %v1290_v1 }
 0x19c   : > { %v997_v59 = vadd.f32 %v2246_v22, %v974_v41  ;;  %v972_v42 = vadd.f32 %v947_v37, %v838_v36  ;;  %1635 = vmatprep.mubr.bf16.mxu1 %v1018_v5  ;;  %v1010_v43 = vmax.f32 %v994_v40, 0.0  ;;  %v1288_v36 = vsel %vm1191_vm6, 1, %v1913_v32 }
 0x19d   : > { %1636 = vmatmul.mubr.bf16.gmra.mxu1 %v1019_v38 }
 0x19e   : > { %v995_v0 = vadd.f32 %v2246_v22, %v972_v42  ;;  %v1013_v13 = vmax.f32 %v997_v59, 0.0 }
 0x1a0   : > { %v1011_v44 = vmax.f32 %v995_v0, 0.0  ;;  %v1021_v46 = vpack.c.bf16 %v1013_v13, %v1012_v8 }
 0x1a2   : > { %v1020_v45 = vpack.c.bf16 %v1011_v44, %v1010_v43  ;;  %v2334_v43 = vrot.slane %v1288_v36, %v1291_v3 }
 0x1a4   : > { %1639 = vmatprep.mubr.bf16.mxu1 %v1020_v45  ;;  %vm1293_vm7 = vcmp.eq.s32.totalorder %v2334_v43, 1 }
 0x1a5   : > { %1640 = vmatmul.mubr.bf16.gmra.mxu1 %v1021_v46 }
 0x24d   : > { %v1629_v47 = vpop.f32.mrf.mxu1 }
 0x24e   : > { %v2275_v48 = vadd.f32 %v1629_v47, %v2272_v39 }
 0x24f   : > { %v1127_v49 = vpop.f32.mrf.mxu1 }
 0x250   : > { %v1493_v22 = vmul.f32 -1.442695, %v2275_v48  ;;  %v2279_v50 = vadd.f32 %v2272_v39, %v1127_v49 }
 0x251   : > { %v1630_v51 = vpop.f32.mrf.mxu1 }
 0x252   : > { %1753 = vpow2.f32 %v1493_v22  ;;  %v1491_v52 = vmul.f32 -1.442695, %v2279_v50  ;;  %v2283_v53 = vadd.f32 %v1630_v51, %v2272_v39 }
 0x253   : > { %v1130_v54 = vpop.f32.mrf.mxu1 }
 0x254   : > { %1755 = vpow2.f32 %v1491_v52  ;;  %v1494_v55 = vmul.f32 -1.442695, %v2283_v53  ;;  %v2287_v56 = vadd.f32 %v2272_v39, %v1130_v54 }
 0x255   : > { %v1633_v57 = vpop.f32.mrf.mxu1 }
 0x256   : > { %1757 = vpow2.f32 %v1494_v55  ;;  %v1492_v58 = vmul.f32 -1.442695, %v2287_v56  ;;  %v2291_v60 = vadd.f32 %v1633_v57, %v2272_v39 }
 0x257   : > { %v1143_v7 = vpop.f32.mrf.mxu1 }
 0x258   : > { %1759 = vpow2.f32 %v1492_v58  ;;  %v1497_v9 = vmul.f32 -1.442695, %v2291_v60  ;;  %v2295_v10 = vadd.f32 %v2272_v39, %v1143_v7 }
 0x259   : > { %v1634_v11 = vpop.f32.mrf.mxu1 }
 0x25a   : > { %1761 = vpow2.f32 %v1497_v9  ;;  %v1495_v12 = vmul.f32 -1.442695, %v2295_v10  ;;  %v2299_v14 = vadd.f32 %v1634_v11, %v2272_v39 }
 0x25b   : > { %v1146_v15 = vpop.f32.mrf.mxu1 }
 0x25c   : > { %1763 = vpow2.f32 %v1495_v12  ;;  %v1498_v16 = vmul.f32 -1.442695, %v2299_v14  ;;  %v2303_v17 = vadd.f32 %v2272_v39, %v1146_v15 }
 0x25d   : > { %v1637_v62 = vpop.f32.mrf.mxu1 }
 0x25e   : > { %1765 = vpow2.f32 %v1498_v16  ;;  %v1496_v20 = vmul.f32 -1.442695, %v2303_v17  ;;  %v2310_v21 = vadd.f32 %v1637_v62, %v2272_v39 }
 0x25f   : > { %v1754_v2 = vpop.eup %1753  ;;  %v1159_v63 = vpop.f32.mrf.mxu1 }
 0x260   : > { %v1242_v23 = vadd.f32 1.0, %v1754_v2  ;;  %1767 = vpow2.f32 %v1496_v20  ;;  %v1501_v24 = vmul.f32 -1.442695, %v2310_v21  ;;  %v2314_v4 = vadd.f32 %v2272_v39, %v1159_v63 }
 0x261   : > { %v1756_v25 = vpop.eup %1755  ;;  %v1638_v26 = vpop.f32.mrf.mxu1 }
 0x262   : > { %1769 = vrcp.f32 %v1242_v23  ;;  %v1240_v28 = vadd.f32 1.0, %v1756_v25  ;;  %v1499_v19 = vmul.f32 -1.442695, %v2314_v4  ;;  %v2318_v29 = vadd.f32 %v1638_v26, %v2272_v39 }
 0x263   : > { %v1758_v27 = vpop.eup %1757  ;;  %1771 = vpow2.f32 %v1501_v24  ;;  %v1162_v30 = vpop.f32.mrf.mxu1 }
 0x264   : > { %1773 = vrcp.f32 %v1240_v28  ;;  %v1243_v31 = vadd.f32 1.0, %v1758_v27  ;;  %v1502_v33 = vmul.f32 -1.442695, %v2318_v29  ;;  %v2322_v34 = vadd.f32 %v2272_v39, %v1162_v30 }
 0x265   : > { %v1760_v35 = vpop.eup %1759  ;;  %1775 = vpow2.f32 %v1499_v19  ;;  %v1641_v41 = vpop.f32.mrf.mxu1 }
 0x266   : > { %1777 = vrcp.f32 %v1243_v31  ;;  %v1241_v5 = vadd.f32 1.0, %v1760_v35  ;;  %v1500_v37 = vmul.f32 -1.442695, %v2322_v34  ;;  %v2327_v38 = vadd.f32 %v1641_v41, %v2272_v39 }
 0x267   : > { %v1762_v40 = vpop.eup %1761  ;;  %1779 = vpow2.f32 %v1502_v33  ;;  %v1175_v59 = vpop.f32.mrf.mxu1 }
 0x268   : > { %1781 = vrcp.f32 %v1241_v5  ;;  %v1246_v42 = vadd.f32 1.0, %v1762_v40  ;;  %v1505_v6 = vmul.f32 -1.442695, %v2327_v38  ;;  %v2332_v0 = vadd.f32 %v2272_v39, %v1175_v59 }
 0x269   : > { %v1764_v13 = vpop.eup %1763  ;;  %1783 = vpow2.f32 %v1500_v37  ;;  %v1642_v44 = vpop.f32.mrf.mxu1 }
 0x26a   : > { %1785 = vrcp.f32 %v1246_v42  ;;  %v1244_v8 = vadd.f32 1.0, %v1764_v13  ;;  %v1503_v45 = vmul.f32 -1.442695, %v2332_v0  ;;  %v2338_v46 = vadd.f32 %v1642_v44, %v2272_v39 }
 0x26b   : > { %v1766_v47 = vpop.eup %1765  ;;  %1787 = vpow2.f32 %v1505_v6  ;;  %v1178_v49 = vpop.f32.mrf.mxu1 }
 0x26c   : > { %1789 = vrcp.f32 %v1244_v8  ;;  %v1247_v22 = vadd.f32 1.0, %v1766_v47  ;;  %v1506_v51 = vmul.f32 -1.442695, %v2338_v46  ;;  %v2344_v52 = vadd.f32 %v2272_v39, %v1178_v49 }
 0x26d   : > { %v1768_v54 = vpop.eup %1767  ;;  %1791 = vpow2.f32 %v1503_v45 }
 0x26e   : > { %1793 = vrcp.f32 %v1247_v22  ;;  %v1245_v55 = vadd.f32 1.0, %v1768_v54  ;;  %v1504_v57 = vmul.f32 -1.442695, %v2344_v52 }
 0x26f   : > { %v1770_v58 = vpop.eup %1769  ;;  %1795 = vpow2.f32 %v1506_v51 }
 0x270   : > { %v1772_v7 = vpop.eup %1771  ;;  %v1296_v9 = vsel %vm1293_vm7, %v1770_v58, %v2275_v48  ;;  %1797 = vrcp.f32 %v1245_v55 }
 0x271   : > { %v1774_v11 = vpop.eup %1773  ;;  %1312 = vst [vmem:[%s2351_s12 + $0x10] sm:$0xff] %v1296_v9  ;;  %v1250_v39 = vadd.f32 1.0, %v1772_v7  ;;  %1799 = vpow2.f32 %v1504_v57 }
 0x272   : > { %v1776_v12 = vpop.eup %1775  ;;  %v1294_v15 = vsel %vm1293_vm7, %v1774_v11, %v2279_v50 }
 0x273   : > { %v1778_v16 = vpop.eup %1777  ;;  %1310 = vst [vmem:[%s2351_s12] sm:$0xff] %v1294_v15  ;;  %1801 = vrcp.f32 %v1250_v39  ;;  %v1248_v48 = vadd.f32 1.0, %v1776_v12 }
 0x274   : > { %v1780_v61 = vpop.eup %1779  ;;  %v1297_v62 = vsel %vm1293_vm7, %v1778_v16, %v2283_v53 }
 0x275   : > { %v1782_v18 = vpop.eup %1781  ;;  %1313 = vst [vmem:[%s2351_s12 + $0x18] sm:$0xff] %v1297_v62  ;;  %1803 = vrcp.f32 %v1248_v48  ;;  %v1251_v20 = vadd.f32 1.0, %v1780_v61 }
 0x276   : > { %v1784_v2 = vpop.eup %1783  ;;  %v1295_v50 = vsel %vm1293_vm7, %v1782_v18, %v2287_v56 }
 0x277   : > { %v1786_v63 = vpop.eup %1785  ;;  %1311 = vst [vmem:[%s2351_s12 + $0x8] sm:$0xff] %v1295_v50  ;;  %1805 = vrcp.f32 %v1251_v20  ;;  %v1249_v23 = vadd.f32 1.0, %v1784_v2 }
 0x278   : > { %v1788_v24 = vpop.eup %1787  ;;  %v1300_v53 = vsel %vm1293_vm7, %v1786_v63, %v2291_v60 }
 0x279   : > { %v1790_v25 = vpop.eup %1789  ;;  %1316 = vst [vmem:[%s2351_s12 + $0x30] sm:$0xff] %v1300_v53  ;;  %1807 = vrcp.f32 %v1249_v23  ;;  %v1254_v1 = vadd.f32 1.0, %v1788_v24 }
 0x27a   : > { %v1792_v26 = vpop.eup %1791  ;;  %v1298_v56 = vsel %vm1293_vm7, %v1790_v25, %v2295_v10 }
 0x27b   : > { %v1794_v28 = vpop.eup %1793  ;;  %1314 = vst [vmem:[%s2351_s12 + $0x20] sm:$0xff] %v1298_v56  ;;  %1809 = vrcp.f32 %v1254_v1  ;;  %v1252_v19 = vadd.f32 1.0, %v1792_v26 }
 0x27c   : > { %v1796_v27 = vpop.eup %1795  ;;  %v1301_v60 = vsel %vm1293_vm7, %v1794_v28, %v2299_v14 }
 0x27d   : > { %v1798_v30 = vpop.eup %1797  ;;  %1317 = vst [vmem:[%s2351_s12 + $0x38] sm:$0xff] %v1301_v60  ;;  %1811 = vrcp.f32 %v1252_v19  ;;  %v1255_v31 = vadd.f32 1.0, %v1796_v27 }
 0x27e   : > { %v1800_v33 = vpop.eup %1799  ;;  %v1299_v10 = vsel %vm1293_vm7, %v1798_v30, %v2303_v17 }
 0x27f   : > { %1315 = vst [vmem:[%s2351_s12 + $0x28] sm:$0xff] %v1299_v10  ;;  %1813 = vrcp.f32 %v1255_v31  ;;  %v1253_v35 = vadd.f32 1.0, %v1800_v33 }
 0x280   : > { %v1802_v32 = vpop.eup %1801 }
 0x281   : > { %v1304_v14 = vsel %vm1293_vm7, %v1802_v32, %v2310_v21  ;;  %1815 = vrcp.f32 %v1253_v35 }
 0x282   : > { %v1804_v36 = vpop.eup %1803  ;;  %1320 = vst [vmem:[%s2351_s12 + $0x50] sm:$0xff] %v1304_v14 }
 0x283   : > { %v1302_v3 = vsel %vm1293_vm7, %v1804_v36, %v2314_v4 }
 0x284   : > { %v1806_v41 = vpop.eup %1805  ;;  %1318 = vst [vmem:[%s2351_s12 + $0x40] sm:$0xff] %v1302_v3 }
 0x285   : > { %v1305_v17 = vsel %vm1293_vm7, %v1806_v41, %v2318_v29 }
 0x286   : > { %v1808_v5 = vpop.eup %1807  ;;  %1321 = vst [vmem:[%s2351_s12 + $0x58] sm:$0xff] %v1305_v17 }
 0x287   : > { %v1303_v21 = vsel %vm1293_vm7, %v1808_v5, %v2322_v34 }
 0x288   : > { %v1810_v37 = vpop.eup %1809  ;;  %1319 = vst [vmem:[%s2351_s12 + $0x48] sm:$0xff] %v1303_v21 }
 0x289   : > { %v1308_v4 = vsel %vm1293_vm7, %v1810_v37, %v2327_v38 }
 0x28a   : > { %v1812_v40 = vpop.eup %1811  ;;  %1324 = vst [vmem:[%s2351_s12 + $0x70] sm:$0xff] %v1308_v4 }
 0x28b   : > { %v1306_v29 = vsel %vm1293_vm7, %v1812_v40, %v2332_v0 }
 0x28c   : > { %v1814_v59 = vpop.eup %1813  ;;  %1322 = vst [vmem:[%s2351_s12 + $0x60] sm:$0xff] %v1306_v29 }
 0x28d   : > { %v1309_v34 = vsel %vm1293_vm7, %v1814_v59, %v2338_v46 }
 0x28e   : > { %v1816_v38 = vpop.eup %1815  ;;  %1325 = vst [vmem:[%s2351_s12 + $0x78] sm:$0xff] %v1309_v34 }
 0x28f   : > { %v1307_v42 = vsel %vm1293_vm7, %v1816_v38, %v2344_v52 }
 0x290   : > { %1323 = vst [vmem:[%s2351_s12 + $0x68] sm:$0xff] %v1307_v42 }
 0x291   : > { %1830 = shalt.err (!%p1827_p6)
}
 0x292   : > { %s1831_s30 = scalar_lea.hbm %s2415_s20, 2048  ;;  %s1835_s18 = scalar_lea.hbm %s2484_s6, 8192 }
 0x293   : > { %p1832_p7 = scmp.ne.s32.totalorder %s2415_s20, %s1831_s30  ;;  %p1836_p11 = scmp.lt.s32.totalorder %s2415_s20, %s2484_s6 }
 0x294   : > { %p1837_p12 = scmp.lt.s32.totalorder %s1835_s18, %s1831_s30 }
 0x295   : > { %p1833_p9 = pnand %p1832_p7, %p2002_p3 }
 0x296   : > { %p1838_p13 = por %p1837_p12, %p1836_p11 }
 0x297   : > { %p1834_p10 = pneg %p1833_p9 }
 0x299   : > { %p1839_p0 = pnand %p1838_p13, %p1834_p10 }
 0x29b   : > { %1842 = shalt.err (!%p1839_p0)
}
 0x29c   : > { %s1915_s9 = smov 128  }
 0x29d   : > { %1647 = dma.vmem_to_hbm [thread:$0]  (%p2002_p3), %s2418_s25, 2048, %s2415_s20, %s2426_s29, %s1915_s9, %s1915_s9, %s1911_s13  }
 0x29e PF: > { %p1653_p1 = scmp.ge.s32.totalorder %s1909_s28, 2  ;;  %s1357_s16 = sand.u32 1, %s1881_s21  }
 0x29f   : > { %s1358_s17 = scalar_lea.sflag [#allocation3], %s1357_s16 }
 0x2a0   : > { %p1650_p2 = pnand %p1653_p1, %p2011_p8 }
 0x2a2   : > { %p1651_p4 = pneg %p1650_p2 }
 0x2a4   : > { %1876 = dma.done.wait (%p1651_p4), %s1358_s17, 2048  }
 0x2a5   : > { %1878 = vsyncadd (%p1651_p4), %s1358_s17, 4294965248  ;;  %s19_s28 = sadd.s32 1, %s1909_s28   ;;  %s2487_s21 = smov %s1885_s22 }
 0x2a6   : > { %p16_p5 = scmp.ge.s32.totalorder %s19_s28, 6   ;;  %s2488_s22 = smov %s1889_s23 }
 0x2a7   : > { %s2489_s23 = smov %s2020_s15  ;;  %s2490_s24 = smov %s1901_s26 }
 0x2a8   : > { %s2491_s25 = smov %s1905_s27  ;;  %s2492_s26 = smov %s2495_s7 }
 0x2a9   : > { %s2493_s27 = smov %s2499_s8  ;;  %18 = sbr.rel (!%p16_p5) target bundleno = 5 (0x5), region = 82 }
 0x2ae   :  { %1363 = vsyncpa [#allocation3], 1 }
 0x2af   :  { %1365 = vsyncpa [#allocation3 + $0x1], 1 }

</bundles_post_ra>
